<compile_context>
chip_gen: v7x
topology: tpu7x:2x2x1
jax: 0.10.0
libtpu: 0.0.40
codegen_flags: <defaults>
</compile_context>

<pallas_src>
import functools

import jax
import jax.numpy as jnp
from jax.experimental import pallas as pl
from jax.experimental.pallas import tpu as pltpu

LANE = 128  # TPU lane width; pad output channels to this for dense stores.


# ---------------------------------------------------------------------------
# Pallas kernel: fused matmul + bias + activation
# ---------------------------------------------------------------------------
def _mm_bias_act_kernel(a_ref, w_ref, b_ref, o_ref, *, act):
    acc = jnp.dot(a_ref[...], w_ref[...], preferred_element_type=jnp.float32)
    y = acc + b_ref[...]                      # (tile_m, N) + (1, N), f32
    if act == "relu":
        y = jnp.maximum(y, 0.0)
    o_ref[...] = y.astype(o_ref.dtype)


def matmul_bias_act(a, w, b, act):
    """out[m, n] = act(a @ w + b).  a: f32 (M,K), w: bf16 (K,N), b: f32 (N,)."""
    M, K = a.shape
    K2, N = w.shape
    assert K == K2
    assert N % LANE == 0, "output channels must be lane-padded"

    # At batch=2 every layer fits in one full-array block; for larger batches
    # (M = N*H*W grows) this tiles M and shards steps across cores.
    tile_m = 256 if (M > 256 and M % 256 == 0) else M
    grid = (M // tile_m,)

    kernel = functools.partial(_mm_bias_act_kernel, act=act)
    return pl.pallas_call(
        kernel,
        out_shape=jax.ShapeDtypeStruct((M, N), jnp.float32),
        grid_spec=pltpu.PrefetchScalarGridSpec(
            num_scalar_prefetch=0,
            grid=grid,
            in_specs=[
                pl.BlockSpec((tile_m, K), lambda i: (i, 0)),
                pl.BlockSpec((K, N), lambda i: (0, 0)),   # weight resident
                pl.BlockSpec((1, N), lambda i: (0, 0)),   # bias resident
            ],
            out_specs=pl.BlockSpec((tile_m, N), lambda i: (i, 0)),
        ),
        compiler_params=pltpu.CompilerParams(
            dimension_semantics=("parallel",)),
    )(a.astype(jnp.bfloat16), w, b.reshape(1, N))


# ---------------------------------------------------------------------------
# Glue: 3x3 / stride-2 / pad-1 im2col (tiny arrays; stays in plain JAX)
# ---------------------------------------------------------------------------
def _im2col_s2(x_nhwc, ho, wo):
    """Patches in (ki,kj)-outer, channel-inner order -> (N*ho*wo, 9*C)."""
    n, h, w, c = x_nhwc.shape
    xp = jnp.pad(x_nhwc, ((0, 0), (1, 1), (1, 1), (0, 0)))
    taps = [xp[:, ki:ki + 2 * ho:2, kj:kj + 2 * wo:2, :]
            for ki in range(3) for kj in range(3)]
    patches = jnp.concatenate(taps, axis=-1)          # (n, ho, wo, 9*c)
    return patches.reshape(n * ho * wo, 9 * c)


# ---------------------------------------------------------------------------
# One-time parameter preprocessing (hoisted out of the jitted forward)
# ---------------------------------------------------------------------------
def _conv_w_mat(w_oihw, cin_pad, cout_pad):
    """(Cout, Cin, 3, 3) -> ((9*cin_pad), cout_pad) bf16, zero-padded."""
    cout, cin, kh, kw = w_oihw.shape
    wt = jnp.transpose(w_oihw, (2, 3, 1, 0))          # (kh, kw, cin, cout)
    wt = jnp.pad(wt, ((0, 0), (0, 0),
                      (0, cin_pad - cin), (0, cout_pad - cout)))
    return wt.reshape(kh * kw * cin_pad, cout_pad).astype(jnp.bfloat16)


def _pad_bias(b, n_pad):
    return jnp.pad(b, (0, n_pad - b.shape[0])).astype(jnp.float32)


def prepare_params(raw, latent_dim=128):
    p = {}
    p["w1"] = _conv_w_mat(raw["conv1_w"], 1, LANE)     # K = 9
    p["b1"] = _pad_bias(raw["conv1_b"], LANE)
    p["w2"] = _conv_w_mat(raw["conv2_w"], LANE, LANE)  # K = 9*128
    p["b2"] = _pad_bias(raw["conv2_b"], LANE)
    p["w3"] = _conv_w_mat(raw["conv3_w"], LANE, LANE)  # K = 9*128
    p["b3"] = _pad_bias(raw["conv3_b"], LANE)
    # PyTorch flattens CHW-major; our activations flatten HWC-major, so
    # permute the fc weight columns once here.
    wf = raw["fc_w"].reshape(latent_dim, 128, 4, 4)
    wf = jnp.transpose(wf, (2, 3, 1, 0)).reshape(4 * 4 * 128, latent_dim)
    p["wf"] = wf.astype(jnp.bfloat16)
    p["bf"] = raw["fc_b"].astype(jnp.float32)
    return p


# ---------------------------------------------------------------------------
# Deterministic raw parameters (PyTorch shapes / conventions)
# ---------------------------------------------------------------------------
def make_raw_params(latent_dim=128, seed=1):
    key = jax.random.PRNGKey(seed)

    def nxt():
        nonlocal key
        key, sub = jax.random.split(key)
        return sub

    def nrm(shape, s=0.05):
        return (s * jax.random.normal(nxt(), shape)).astype(jnp.float32)

    return {
        "conv1_w": nrm((32, 1, 3, 3)),   "conv1_b": nrm((32,)),
        "conv2_w": nrm((64, 32, 3, 3)),  "conv2_b": nrm((64,)),
        "conv3_w": nrm((128, 64, 3, 3)), "conv3_b": nrm((128,)),
        "fc_w": nrm((latent_dim, 128 * 4 * 4)), "fc_b": nrm((latent_dim,)),
    }


# ---------------------------------------------------------------------------
# Full forward pass (matches MNISTEncoder.forward)
# ---------------------------------------------------------------------------
@jax.jit
def mnist_encoder_forward(x, p):
    if x.ndim == 3:                       # (C,H,W) -> (1,C,H,W)
        x = x[None]
    if x.shape[1] == 3:                   # RGB -> grayscale mean
        x = jnp.mean(x, axis=1, keepdims=True)
    n = x.shape[0]

    h = jnp.transpose(x, (0, 2, 3, 1))    # NCHW -> NHWC, C = 1

    # conv1: 1 -> 32 (lane-padded to 128), 28x28 -> 14x14
    a = _im2col_s2(h, 14, 14)                                  # (n*196, 9)
    h = matmul_bias_act(a, p["w1"], p["b1"], "relu").reshape(n, 14, 14, LANE)

    # conv2: 32 -> 64 (both lane-padded), 14x14 -> 7x7
    a = _im2col_s2(h, 7, 7)                                    # (n*49, 1152)
    h = matmul_bias_act(a, p["w2"], p["b2"], "relu").reshape(n, 7, 7, LANE)

    # conv3: 64 -> 128, 7x7 -> 4x4
    a = _im2col_s2(h, 4, 4)                                    # (n*16, 1152)
    h = matmul_bias_act(a, p["w3"], p["b3"], "relu").reshape(n, 4, 4, LANE)

    # flatten (HWC order; fc weight pre-permuted to match) + fc
    a = h.reshape(n, 4 * 4 * LANE)                             # (n, 2048)
    return matmul_bias_act(a, p["wf"], p["bf"], None)          # (n, latent)


# ---------------------------------------------------------------------------
# Pure-JAX reference (PyTorch semantics) for a correctness spot-check
# ---------------------------------------------------------------------------
def reference_forward(x, raw):
    if x.ndim == 3:
        x = x[None]
    if x.shape[1] == 3:
        x = jnp.mean(x, axis=1, keepdims=True)

    def conv(h, w, b):
        y = jax.lax.conv_general_dilated(
            h, w, window_strides=(2, 2), padding=((1, 1), (1, 1)),
            dimension_numbers=("NCHW", "OIHW", "NCHW"))
        return jax.nn.relu(y + b[None, :, None, None])

    h = conv(x, raw["conv1_w"], raw["conv1_b"])
    h = conv(h, raw["conv2_w"], raw["conv2_b"])
    h = conv(h, raw["conv3_w"], raw["conv3_b"])
    h = h.reshape(h.shape[0], -1)                 # CHW-major, like torch
    return h @ raw["fc_w"].T + raw["fc_b"]


if __name__ == "__main__":
    latent_dim = 128
    batch = 2

    raw = make_raw_params(latent_dim)
    params = prepare_params(raw, latent_dim)
    x = jax.random.normal(jax.random.PRNGKey(0), (batch, 1, 28, 28),
                          dtype=jnp.float32)

    out = mnist_encoder_forward(x, params)
    jax.block_until_ready(out)
    assert out.shape == (batch, latent_dim), out.shape
    assert bool(jnp.all(jnp.isfinite(out)))

    ref = reference_forward(x, raw)
    err = float(jnp.max(jnp.abs(out - ref)))
    assert err < 5e-2, f"max abs err vs reference: {err}"

    print("KERNEL_OK")
</pallas_src>

<mosaic_0001>
module attributes {stable_mosaic.version = 11 : i64} {
  func.func @_mm_bias_act_kernel(%arg0: i32, %arg1: memref<392x9xbf16, #tpu.memory_space<vmem>>, %arg2: memref<9x128xbf16, #tpu.memory_space<vmem>>, %arg3: memref<1x128xf32, #tpu.memory_space<vmem>>, %arg4: memref<392x128xf32, #tpu.memory_space<vmem>>) attributes {dimension_semantics = [#tpu.dimension_semantics<parallel>], iteration_bounds = array<i64: 1>, scalar_prefetch = 0 : i64, scratch_operands = 0 : i64, tpu.core_type = #tpu.core_type<tc>, window_params = [{transform_indices = @transform_0, window_bounds = array<i64: 392, 9>}, {pipeline_mode = #tpu.pipeline_mode<synchronous>, transform_indices = @transform_1, window_bounds = array<i64: 9, 128>}, {pipeline_mode = #tpu.pipeline_mode<synchronous>, transform_indices = @transform_2, window_bounds = array<i64: 1, 128>}, {transform_indices = @transform_3, window_bounds = array<i64: 392, 128>}]} {
    %c0 = arith.constant 0 : index
    %c0_0 = arith.constant 0 : index
    %0 = vector.load %arg1[%c0, %c0_0] : memref<392x9xbf16, #tpu.memory_space<vmem>>, vector<392x9xbf16>
    %c0_1 = arith.constant 0 : index
    %c0_2 = arith.constant 0 : index
    %1 = vector.load %arg2[%c0_1, %c0_2] : memref<9x128xbf16, #tpu.memory_space<vmem>>, vector<9x128xbf16>
    %cst = arith.constant dense<0.000000e+00> : vector<392x128xf32>
    %2 = tpu.matmul %0, %1, %cst {dimension_numbers = #tpu.dot_dimension_numbers<[1], [0], [0], [1], [0, 0, 1, 1], [], []>} : vector<392x9xbf16>, vector<9x128xbf16>, vector<392x128xf32> -> vector<392x128xf32>
    %c0_3 = arith.constant 0 : index
    %c0_4 = arith.constant 0 : index
    %3 = vector.load %arg3[%c0_3, %c0_4] : memref<1x128xf32, #tpu.memory_space<vmem>>, vector<1x128xf32>
    %4 = vector.broadcast %3 : vector<1x128xf32> to vector<392x128xf32>
    %5 = arith.addf %2, %4 : vector<392x128xf32>
    %cst_5 = arith.constant 0.000000e+00 : f32
    %6 = vector.broadcast %cst_5 : f32 to vector<392x128xf32>
    %7 = arith.maximumf %5, %6 : vector<392x128xf32>
    %c0_6 = arith.constant 0 : index
    %c0_7 = arith.constant 0 : index
    %8 = vector.load %arg4[%c0_6, %c0_7] : memref<392x128xf32, #tpu.memory_space<vmem>>, vector<392x128xf32>
    tpu.vector_store %arg4[%c0_6, %c0_7], %7 {strides = array<i32>} : memref<392x128xf32, #tpu.memory_space<vmem>>, vector<392x128xf32>,
    return
  }
  func.func @transform_0(%arg0: i32) -> (i32, i32) {
    %c0_i32 = arith.constant 0 : i32
    %c0_i32_0 = arith.constant 0 : i32
    return %arg0, %c0_i32 : i32, i32
  }
  func.func @transform_1(%arg0: i32) -> (i32, i32) {
    %c0_i32 = arith.constant 0 : i32
    %c0_i32_0 = arith.constant 0 : i32
    %c0_i32_1 = arith.constant 0 : i32
    return %c0_i32, %c0_i32_0 : i32, i32
  }
  func.func @transform_2(%arg0: i32) -> (i32, i32) {
    %c0_i32 = arith.constant 0 : i32
    %c0_i32_0 = arith.constant 0 : i32
    %c0_i32_1 = arith.constant 0 : i32
    return %c0_i32, %c0_i32_0 : i32, i32
  }
  func.func @transform_3(%arg0: i32) -> (i32, i32) {
    %c0_i32 = arith.constant 0 : i32
    %c0_i32_0 = arith.constant 0 : i32
    return %arg0, %c0_i32 : i32, i32
  }
}

module attributes {stable_mosaic.version = 11 : i64} {
  func.func @_mm_bias_act_kernel(%arg0: i32, %arg1: memref<98x1152xbf16, #tpu.memory_space<vmem>>, %arg2: memref<1152x128xbf16, #tpu.memory_space<vmem>>, %arg3: memref<1x128xf32, #tpu.memory_space<vmem>>, %arg4: memref<98x128xf32, #tpu.memory_space<vmem>>) attributes {dimension_semantics = [#tpu.dimension_semantics<parallel>], iteration_bounds = array<i64: 1>, scalar_prefetch = 0 : i64, scratch_operands = 0 : i64, tpu.core_type = #tpu.core_type<tc>, window_params = [{transform_indices = @transform_0, window_bounds = array<i64: 98, 1152>}, {pipeline_mode = #tpu.pipeline_mode<synchronous>, transform_indices = @transform_1, window_bounds = array<i64: 1152, 128>}, {pipeline_mode = #tpu.pipeline_mode<synchronous>, transform_indices = @transform_2, window_bounds = array<i64: 1, 128>}, {transform_indices = @transform_3, window_bounds = array<i64: 98, 128>}]} {
    %c0 = arith.constant 0 : index
    %c0_0 = arith.constant 0 : index
    %0 = vector.load %arg1[%c0, %c0_0] : memref<98x1152xbf16, #tpu.memory_space<vmem>>, vector<98x1152xbf16>
    %c0_1 = arith.constant 0 : index
    %c0_2 = arith.constant 0 : index
    %1 = vector.load %arg2[%c0_1, %c0_2] : memref<1152x128xbf16, #tpu.memory_space<vmem>>, vector<1152x128xbf16>
    %cst = arith.constant dense<0.000000e+00> : vector<98x128xf32>
    %2 = tpu.matmul %0, %1, %cst {dimension_numbers = #tpu.dot_dimension_numbers<[1], [0], [0], [1], [0, 0, 1, 1], [], []>} : vector<98x1152xbf16>, vector<1152x128xbf16>, vector<98x128xf32> -> vector<98x128xf32>
    %c0_3 = arith.constant 0 : index
    %c0_4 = arith.constant 0 : index
    %3 = vector.load %arg3[%c0_3, %c0_4] : memref<1x128xf32, #tpu.memory_space<vmem>>, vector<1x128xf32>
    %4 = vector.broadcast %3 : vector<1x128xf32> to vector<98x128xf32>
    %5 = arith.addf %2, %4 : vector<98x128xf32>
    %cst_5 = arith.constant 0.000000e+00 : f32
    %6 = vector.broadcast %cst_5 : f32 to vector<98x128xf32>
    %7 = arith.maximumf %5, %6 : vector<98x128xf32>
    %c0_6 = arith.constant 0 : index
    %c0_7 = arith.constant 0 : index
    %8 = vector.load %arg4[%c0_6, %c0_7] : memref<98x128xf32, #tpu.memory_space<vmem>>, vector<98x128xf32>
    tpu.vector_store %arg4[%c0_6, %c0_7], %7 {strides = array<i32>} : memref<98x128xf32, #tpu.memory_space<vmem>>, vector<98x128xf32>,
    return
  }
  func.func @transform_0(%arg0: i32) -> (i32, i32) {
    %c0_i32 = arith.constant 0 : i32
    %c0_i32_0 = arith.constant 0 : i32
    return %arg0, %c0_i32 : i32, i32
  }
  func.func @transform_1(%arg0: i32) -> (i32, i32) {
    %c0_i32 = arith.constant 0 : i32
    %c0_i32_0 = arith.constant 0 : i32
    %c0_i32_1 = arith.constant 0 : i32
    return %c0_i32, %c0_i32_0 : i32, i32
  }
  func.func @transform_2(%arg0: i32) -> (i32, i32) {
    %c0_i32 = arith.constant 0 : i32
    %c0_i32_0 = arith.constant 0 : i32
    %c0_i32_1 = arith.constant 0 : i32
    return %c0_i32, %c0_i32_0 : i32, i32
  }
  func.func @transform_3(%arg0: i32) -> (i32, i32) {
    %c0_i32 = arith.constant 0 : i32
    %c0_i32_0 = arith.constant 0 : i32
    return %arg0, %c0_i32 : i32, i32
  }
}

module attributes {stable_mosaic.version = 11 : i64} {
  func.func @_mm_bias_act_kernel(%arg0: i32, %arg1: memref<32x1152xbf16, #tpu.memory_space<vmem>>, %arg2: memref<1152x128xbf16, #tpu.memory_space<vmem>>, %arg3: memref<1x128xf32, #tpu.memory_space<vmem>>, %arg4: memref<32x128xf32, #tpu.memory_space<vmem>>) attributes {dimension_semantics = [#tpu.dimension_semantics<parallel>], iteration_bounds = array<i64: 1>, scalar_prefetch = 0 : i64, scratch_operands = 0 : i64, tpu.core_type = #tpu.core_type<tc>, window_params = [{transform_indices = @transform_0, window_bounds = array<i64: 32, 1152>}, {pipeline_mode = #tpu.pipeline_mode<synchronous>, transform_indices = @transform_1, window_bounds = array<i64: 1152, 128>}, {pipeline_mode = #tpu.pipeline_mode<synchronous>, transform_indices = @transform_2, window_bounds = array<i64: 1, 128>}, {transform_indices = @transform_3, window_bounds = array<i64: 32, 128>}]} {
    %c0 = arith.constant 0 : index
    %c0_0 = arith.constant 0 : index
    %0 = vector.load %arg1[%c0, %c0_0] : memref<32x1152xbf16, #tpu.memory_space<vmem>>, vector<32x1152xbf16>
    %c0_1 = arith.constant 0 : index
    %c0_2 = arith.constant 0 : index
    %1 = vector.load %arg2[%c0_1, %c0_2] : memref<1152x128xbf16, #tpu.memory_space<vmem>>, vector<1152x128xbf16>
    %cst = arith.constant dense<0.000000e+00> : vector<32x128xf32>
    %2 = tpu.matmul %0, %1, %cst {dimension_numbers = #tpu.dot_dimension_numbers<[1], [0], [0], [1], [0, 0, 1, 1], [], []>} : vector<32x1152xbf16>, vector<1152x128xbf16>, vector<32x128xf32> -> vector<32x128xf32>
    %c0_3 = arith.constant 0 : index
    %c0_4 = arith.constant 0 : index
    %3 = vector.load %arg3[%c0_3, %c0_4] : memref<1x128xf32, #tpu.memory_space<vmem>>, vector<1x128xf32>
    %4 = vector.broadcast %3 : vector<1x128xf32> to vector<32x128xf32>
    %5 = arith.addf %2, %4 : vector<32x128xf32>
    %cst_5 = arith.constant 0.000000e+00 : f32
    %6 = vector.broadcast %cst_5 : f32 to vector<32x128xf32>
    %7 = arith.maximumf %5, %6 : vector<32x128xf32>
    %c0_6 = arith.constant 0 : index
    %c0_7 = arith.constant 0 : index
    %8 = vector.load %arg4[%c0_6, %c0_7] : memref<32x128xf32, #tpu.memory_space<vmem>>, vector<32x128xf32>
    tpu.vector_store %arg4[%c0_6, %c0_7], %7 {strides = array<i32>} : memref<32x128xf32, #tpu.memory_space<vmem>>, vector<32x128xf32>,
    return
  }
  func.func @transform_0(%arg0: i32) -> (i32, i32) {
    %c0_i32 = arith.constant 0 : i32
    %c0_i32_0 = arith.constant 0 : i32
    return %arg0, %c0_i32 : i32, i32
  }
  func.func @transform_1(%arg0: i32) -> (i32, i32) {
    %c0_i32 = arith.constant 0 : i32
    %c0_i32_0 = arith.constant 0 : i32
    %c0_i32_1 = arith.constant 0 : i32
    return %c0_i32, %c0_i32_0 : i32, i32
  }
  func.func @transform_2(%arg0: i32) -> (i32, i32) {
    %c0_i32 = arith.constant 0 : i32
    %c0_i32_0 = arith.constant 0 : i32
    %c0_i32_1 = arith.constant 0 : i32
    return %c0_i32, %c0_i32_0 : i32, i32
  }
  func.func @transform_3(%arg0: i32) -> (i32, i32) {
    %c0_i32 = arith.constant 0 : i32
    %c0_i32_0 = arith.constant 0 : i32
    return %arg0, %c0_i32 : i32, i32
  }
}

module attributes {stable_mosaic.version = 11 : i64} {
  func.func @_mm_bias_act_kernel(%arg0: i32, %arg1: memref<2x2048xbf16, #tpu.memory_space<vmem>>, %arg2: memref<2048x128xbf16, #tpu.memory_space<vmem>>, %arg3: memref<1x128xf32, #tpu.memory_space<vmem>>, %arg4: memref<2x128xf32, #tpu.memory_space<vmem>>) attributes {dimension_semantics = [#tpu.dimension_semantics<parallel>], iteration_bounds = array<i64: 1>, scalar_prefetch = 0 : i64, scratch_operands = 0 : i64, tpu.core_type = #tpu.core_type<tc>, window_params = [{transform_indices = @transform_0, window_bounds = array<i64: 2, 2048>}, {pipeline_mode = #tpu.pipeline_mode<synchronous>, transform_indices = @transform_1, window_bounds = array<i64: 2048, 128>}, {pipeline_mode = #tpu.pipeline_mode<synchronous>, transform_indices = @transform_2, window_bounds = array<i64: 1, 128>}, {transform_indices = @transform_3, window_bounds = array<i64: 2, 128>}]} {
    %c0 = arith.constant 0 : index
    %c0_0 = arith.constant 0 : index
    %0 = vector.load %arg1[%c0, %c0_0] : memref<2x2048xbf16, #tpu.memory_space<vmem>>, vector<2x2048xbf16>
    %c0_1 = arith.constant 0 : index
    %c0_2 = arith.constant 0 : index
    %1 = vector.load %arg2[%c0_1, %c0_2] : memref<2048x128xbf16, #tpu.memory_space<vmem>>, vector<2048x128xbf16>
    %cst = arith.constant dense<0.000000e+00> : vector<2x128xf32>
    %2 = tpu.matmul %0, %1, %cst {dimension_numbers = #tpu.dot_dimension_numbers<[1], [0], [0], [1], [0, 0, 1, 1], [], []>} : vector<2x2048xbf16>, vector<2048x128xbf16>, vector<2x128xf32> -> vector<2x128xf32>
    %c0_3 = arith.constant 0 : index
    %c0_4 = arith.constant 0 : index
    %3 = vector.load %arg3[%c0_3, %c0_4] : memref<1x128xf32, #tpu.memory_space<vmem>>, vector<1x128xf32>
    %4 = vector.broadcast %3 : vector<1x128xf32> to vector<2x128xf32>
    %5 = arith.addf %2, %4 : vector<2x128xf32>
    %c0_5 = arith.constant 0 : index
    %c0_6 = arith.constant 0 : index
    %6 = vector.load %arg4[%c0_5, %c0_6] : memref<2x128xf32, #tpu.memory_space<vmem>>, vector<2x128xf32>
    tpu.vector_store %arg4[%c0_5, %c0_6], %5 {strides = array<i32>} : memref<2x128xf32, #tpu.memory_space<vmem>>, vector<2x128xf32>,
    return
  }
  func.func @transform_0(%arg0: i32) -> (i32, i32) {
    %c0_i32 = arith.constant 0 : i32
    %c0_i32_0 = arith.constant 0 : i32
    return %arg0, %c0_i32 : i32, i32
  }
  func.func @transform_1(%arg0: i32) -> (i32, i32) {
    %c0_i32 = arith.constant 0 : i32
    %c0_i32_0 = arith.constant 0 : i32
    %c0_i32_1 = arith.constant 0 : i32
    return %c0_i32, %c0_i32_0 : i32, i32
  }
  func.func @transform_2(%arg0: i32) -> (i32, i32) {
    %c0_i32 = arith.constant 0 : i32
    %c0_i32_0 = arith.constant 0 : i32
    %c0_i32_1 = arith.constant 0 : i32
    return %c0_i32, %c0_i32_0 : i32, i32
  }
  func.func @transform_3(%arg0: i32) -> (i32, i32) {
    %c0_i32 = arith.constant 0 : i32
    %c0_i32_0 = arith.constant 0 : i32
    return %arg0, %c0_i32 : i32, i32
  }
}

</mosaic_0001>

<bundles_post_ra>
// kernel: mnist_encoder_forward.4
= control target key start
LH: loop header
LB: loop body
LE: loop exit
PB: predicated region body
PF: predicated region fallthrough
CT: control target
= control target key end

     0   :  { %vm277_vm0 = vcmask 1043456   ;;  %vm278_vm1 = vcmask 1044480   ;;  %v829_v0 = vmov 0.0   ;;  %v830_v2 = vmov 65535   ;;  %s1208_s1 = inlined_call_operand.vmem [shape: bf16[9,128], index: 1, kind: input, shape index: {}]   ;;  %s1209_s0 = inlined_call_operand.vmem [shape: bf16[392,9], index: 0, kind: input, shape index: {}]   ;;  %s1210_s2 = inlined_call_operand.vmem [shape: f32[1,128], index: 2, kind: input, shape index: {}]   ;;  %s1211_s3 = inlined_call_operand.vmem [shape: f32[392,128], index: 3, kind: output, shape index: {}]  }
   0x1   :  { %696 = vmatprep.subr.bf16.mxu0 %v829_v0  ;;  %v803_v1 = vld [vmem:[%s1208_s1] sm:$0x1f]   ;;  %798 = vmatprep.subr.bf16.mxu1 %v829_v0  ;;  %v279_v3 = vsel %vm277_vm0, 4294967295, %v830_v2  ;;  %vm831_vm2 = vmmov 0   ;;  %v805_v7 = vld [vmem:[%s1209_s0 + $0x68] sm:$0xff]   ;;  %vm201_vm3 = vcmask 72704  }
   0x2   :  { %v280_v4 = vsel %vm278_vm1, %v279_v3, 0  ;;  %698 = vmatprep.mubr.msk.bf16.mxu0 %vm831_vm2, %v829_v0  ;;  %v804_v5 = vld [vmem:[%s1209_s0] sm:$0xff]   ;;  %750 = vmatprep.mubr.msk.bf16.mxu1 %vm831_vm2, %v829_v0  ;;  %v806_v8 = vld [vmem:[%s1209_s0 + $0x8] sm:$0xff]   ;;  %v807_v9 = vld [vmem:[%s1209_s0 + $0x70] sm:$0xff]  }
   0x3   :  { %v282_v6 = vand.u32 %v803_v1, %v280_v4  ;;  %v808_v10 = vld [vmem:[%s1209_s0 + $0x10] sm:$0xff]   ;;  %v809_v11 = vld [vmem:[%s1209_s0 + $0x78] sm:$0xff]   ;;  %v811_v13 = vld [vmem:[%s1209_s0 + $0x80] sm:$0xff]  }
   0x4   :  { %v810_v12 = vld [vmem:[%s1209_s0 + $0x18] sm:$0xff]   ;;  %v812_v14 = vld [vmem:[%s1209_s0 + $0x20] sm:$0xff]   ;;  %v813_v15 = vld [vmem:[%s1209_s0 + $0x88] sm:$0xff]  }
   0x5   :  { %697 = vmatpush3.bf16.msra.mxu0 %v282_v6  ;;  %799 = vmatpush3.bf16.msra.mxu1 %v282_v6  ;;  %v814_v16 = vld [vmem:[%s1209_s0 + $0x28] sm:$0xff]   ;;  %v815_v17 = vld [vmem:[%s1209_s0 + $0x90] sm:$0xff]   ;;  %v817_v19 = vld [vmem:[%s1209_s0 + $0x98] sm:$0xff]  }
   0x6   :  { %v816_v18 = vld [vmem:[%s1209_s0 + $0x30] sm:$0xff]   ;;  %v818_v20 = vld [vmem:[%s1209_s0 + $0x38] sm:$0xff]   ;;  %v819_v21 = vld [vmem:[%s1209_s0 + $0xa0] sm:$0xff]  }
   0x7   :  { %v820_v22 = vld [vmem:[%s1209_s0 + $0x40] sm:$0xff]   ;;  %v821_v23 = vld [vmem:[%s1209_s0 + $0xa8] sm:$0xff]   ;;  %v823_v25 = vld [vmem:[%s1209_s0 + $0xb0] sm:$0xff]  }
   0x8   :  { %699 = vmatmul.mubr.msk.bf16.vlgmr.msra.gmra.mrb[0].mxu0 %vm201_vm3, %v804_v5  ;;  %751 = vmatmul.mubr.msk.bf16.vlgmr.msra.gmra.mrb[0].mxu1 %vm201_vm3, %v805_v7  ;;  %v822_v24 = vld [vmem:[%s1209_s0 + $0x48] sm:$0xff]   ;;  %v824_v26 = vld [vmem:[%s1209_s0 + $0x50] sm:$0xff]   ;;  %v825_v27 = vld [vmem:[%s1209_s0 + $0xb8] sm:$0xff]  }
   0x9   :  { %702 = vmatprep.mubr.msk.bf16.mxu0 %vm831_vm2, %v829_v0  ;;  %754 = vmatprep.mubr.msk.bf16.mxu1 %vm831_vm2, %v829_v0  ;;  %v826_v28 = vld [vmem:[%s1209_s0 + $0x58] sm:$0xff]   ;;  %v827_v29 = vld [vmem:[%s1209_s0 + $0xc0] ss:$0 sps:$4 sm:$0xff]  }
   0xa   :  { %v828_v30 = vld [vmem:[%s1209_s0 + $0x60] sm:$0xff]  }
   0xb   :  { %v1010_v31 = vld [vmem:[%s1210_s2] ss:$0 sm:$0xff] }
  0x10   :  { %703 = vmatmul.mubr.msk.bf16.gmra.mrb[4].mxu0 %vm201_vm3, %v806_v8  ;;  %755 = vmatmul.mubr.msk.bf16.gmra.mrb[4].mxu1 %vm201_vm3, %v807_v9 }
  0x11   :  { %706 = vmatprep.mubr.msk.bf16.mxu0 %vm831_vm2, %v829_v0  ;;  %758 = vmatprep.mubr.msk.bf16.mxu1 %vm831_vm2, %v829_v0 }
  0x18   :  { %707 = vmatmul.mubr.msk.bf16.gmra.mrb[8].mxu0 %vm201_vm3, %v808_v10  ;;  %759 = vmatmul.mubr.msk.bf16.gmra.mrb[8].mxu1 %vm201_vm3, %v809_v11 }
  0x19   :  { %710 = vmatprep.mubr.msk.bf16.mxu0 %vm831_vm2, %v829_v0  ;;  %762 = vmatprep.mubr.msk.bf16.mxu1 %vm831_vm2, %v829_v0 }
  0x20   :  { %711 = vmatmul.mubr.msk.bf16.gmra.mrb[12].mxu0 %vm201_vm3, %v810_v12  ;;  %763 = vmatmul.mubr.msk.bf16.gmra.mrb[12].mxu1 %vm201_vm3, %v811_v13 }
  0x21   :  { %714 = vmatprep.mubr.msk.bf16.mxu0 %vm831_vm2, %v829_v0  ;;  %766 = vmatprep.mubr.msk.bf16.mxu1 %vm831_vm2, %v829_v0 }
  0x28   :  { %715 = vmatmul.mubr.msk.bf16.gmra.mrb[16].mxu0 %vm201_vm3, %v812_v14  ;;  %767 = vmatmul.mubr.msk.bf16.gmra.mrb[16].mxu1 %vm201_vm3, %v813_v15 }
  0x29   :  { %718 = vmatprep.mubr.msk.bf16.mxu0 %vm831_vm2, %v829_v0  ;;  %770 = vmatprep.mubr.msk.bf16.mxu1 %vm831_vm2, %v829_v0 }
  0x30   :  { %719 = vmatmul.mubr.msk.bf16.gmra.mrb[20].mxu0 %vm201_vm3, %v814_v16  ;;  %771 = vmatmul.mubr.msk.bf16.gmra.mrb[20].mxu1 %vm201_vm3, %v815_v17 }
  0x31   :  { %722 = vmatprep.mubr.msk.bf16.mxu0 %vm831_vm2, %v829_v0  ;;  %774 = vmatprep.mubr.msk.bf16.mxu1 %vm831_vm2, %v829_v0 }
  0x38   :  { %723 = vmatmul.mubr.msk.bf16.gmra.mrb[24].mxu0 %vm201_vm3, %v816_v18  ;;  %775 = vmatmul.mubr.msk.bf16.gmra.mrb[24].mxu1 %vm201_vm3, %v817_v19 }
  0x39   :  { %726 = vmatprep.mubr.msk.bf16.mxu0 %vm831_vm2, %v829_v0  ;;  %778 = vmatprep.mubr.msk.bf16.mxu1 %vm831_vm2, %v829_v0 }
  0x40   :  { %727 = vmatmul.mubr.msk.bf16.gmra.mrb[28].mxu0 %vm201_vm3, %v818_v20  ;;  %779 = vmatmul.mubr.msk.bf16.gmra.mrb[28].mxu1 %vm201_vm3, %v819_v21 }
  0x41   :  { %730 = vmatprep.mubr.msk.bf16.mxu0 %vm831_vm2, %v829_v0  ;;  %782 = vmatprep.mubr.msk.bf16.mxu1 %vm831_vm2, %v829_v0 }
  0x48   :  { %731 = vmatmul.mubr.msk.bf16.gmra.mrb[32].mxu0 %vm201_vm3, %v820_v22  ;;  %783 = vmatmul.mubr.msk.bf16.gmra.mrb[32].mxu1 %vm201_vm3, %v821_v23 }
  0x49   :  { %734 = vmatprep.mubr.msk.bf16.mxu0 %vm831_vm2, %v829_v0  ;;  %786 = vmatprep.mubr.msk.bf16.mxu1 %vm831_vm2, %v829_v0 }
  0x50   :  { %735 = vmatmul.mubr.msk.bf16.gmra.mrb[36].mxu0 %vm201_vm3, %v822_v24  ;;  %787 = vmatmul.mubr.msk.bf16.gmra.mrb[36].mxu1 %vm201_vm3, %v823_v25 }
  0x51   :  { %738 = vmatprep.mubr.msk.bf16.mxu0 %vm831_vm2, %v829_v0  ;;  %790 = vmatprep.mubr.msk.bf16.mxu1 %vm831_vm2, %v829_v0 }
  0x58   :  { %739 = vmatmul.mubr.msk.bf16.gmra.mrb[40].mxu0 %vm201_vm3, %v824_v26  ;;  %791 = vmatmul.mubr.msk.bf16.gmra.mrb[40].mxu1 %vm201_vm3, %v825_v27 }
  0x59   :  { %742 = vmatprep.mubr.msk.bf16.mxu0 %vm831_vm2, %v829_v0  ;;  %794 = vmatprep.mubr.msk.bf16.mxu1 %vm831_vm2, %v829_v0 }
  0x60   :  { %743 = vmatmul.mubr.msk.bf16.gmra.mrb[44].mxu0 %vm201_vm3, %v826_v28  ;;  %795 = vmatmul.mubr.msk.bf16.gmra.mrb[44].mxu1 %vm201_vm3, %v827_v29 }
  0x61   :  { %746 = vmatprep.mubr.msk.bf16.mxu0 %vm831_vm2, %v829_v0 }
  0x68   :  { %747 = vmatmul.mubr.msk.bf16.gmra.mrb[48].mxu0 %vm201_vm3, %v828_v30 }
  0xdb   :  { %v318_v32 = vpop.f32.mrb[0].mxu0  ;;  %v422_v33 = vpop.f32.mrb[0].mxu1 }
  0xdc   :  { %v319_v34 = vadd.f32 %v1010_v31, %v318_v32  ;;  %v700_v35 = vpop.f32.mrb[1].mxu0  ;;  %v423_v36 = vadd.f32 %v1010_v31, %v422_v33  ;;  %v752_v37 = vpop.f32.mrb[1].mxu1 }
  0xdd   :  { %v321_v38 = vpop.f32.mrb[2].mxu0  ;;  %v425_v39 = vpop.f32.mrb[2].mxu1 }
  0xde   :  { %v516_v40 = vmax.f32 %v319_v34, 0.0  ;;  %v322_v41 = vadd.f32 %v1010_v31, %v321_v38  ;;  %v701_v42 = vpop.f32.mrb[3].mxu0  ;;  %v542_v43 = vmax.f32 %v423_v36, 0.0  ;;  %v426_v44 = vadd.f32 %v1010_v31, %v425_v39  ;;  %v753_v45 = vpop.f32.mrb[3].mxu1 }
  0xe0   :  { %565 = vst [vmem:[%s1211_s3] sm:$0xff] %v516_v40  ;;  %v517_v46 = vmax.f32 %v322_v41, 0.0  ;;  %591 = vst [vmem:[%s1211_s3 + $0xd0] sm:$0xff] %v542_v43  ;;  %v543_v47 = vmax.f32 %v426_v44, 0.0 }
  0xe2   :  { %566 = vst [vmem:[%s1211_s3 + $0x8] sm:$0xff] %v517_v46  ;;  %592 = vst [vmem:[%s1211_s3 + $0xd8] sm:$0xff] %v543_v47 }
  0xe3   :  { %v326_v48 = vpop.f32.mrb[4].mxu0  ;;  %v430_v49 = vpop.f32.mrb[4].mxu1 }
  0xe4   :  { %v327_v50 = vadd.f32 %v1010_v31, %v326_v48  ;;  %v704_v51 = vpop.f32.mrb[5].mxu0  ;;  %v431_v52 = vadd.f32 %v1010_v31, %v430_v49  ;;  %v756_v53 = vpop.f32.mrb[5].mxu1 }
  0xe5   :  { %v329_v54 = vpop.f32.mrb[6].mxu0  ;;  %v433_v55 = vpop.f32.mrb[6].mxu1 }
  0xe6   :  { %v518_v56 = vmax.f32 %v327_v50, 0.0  ;;  %v330_v57 = vadd.f32 %v1010_v31, %v329_v54  ;;  %v705_v58 = vpop.f32.mrb[7].mxu0  ;;  %v544_v59 = vmax.f32 %v431_v52, 0.0  ;;  %v434_v60 = vadd.f32 %v1010_v31, %v433_v55  ;;  %v757_v61 = vpop.f32.mrb[7].mxu1 }
  0xe8   :  { %567 = vst [vmem:[%s1211_s3 + $0x10] sm:$0xff] %v518_v56  ;;  %v519_v62 = vmax.f32 %v330_v57, 0.0  ;;  %593 = vst [vmem:[%s1211_s3 + $0xe0] sm:$0xff] %v544_v59  ;;  %v545_v63 = vmax.f32 %v434_v60, 0.0 }
  0xea   :  { %568 = vst [vmem:[%s1211_s3 + $0x18] sm:$0xff] %v519_v62  ;;  %594 = vst [vmem:[%s1211_s3 + $0xe8] sm:$0xff] %v545_v63 }
  0xeb   :  { %v334_v0 = vpop.f32.mrb[8].mxu0  ;;  %v438_v1 = vpop.f32.mrb[8].mxu1 }
  0xec   :  { %v335_v2 = vadd.f32 %v1010_v31, %v334_v0  ;;  %v708_v3 = vpop.f32.mrb[9].mxu0  ;;  %v439_v4 = vadd.f32 %v1010_v31, %v438_v1  ;;  %v760_v5 = vpop.f32.mrb[9].mxu1 }
  0xed   :  { %v337_v6 = vpop.f32.mrb[10].mxu0  ;;  %v441_v7 = vpop.f32.mrb[10].mxu1 }
  0xee   :  { %v520_v8 = vmax.f32 %v335_v2, 0.0  ;;  %v338_v9 = vadd.f32 %v1010_v31, %v337_v6  ;;  %v709_v10 = vpop.f32.mrb[11].mxu0  ;;  %v546_v11 = vmax.f32 %v439_v4, 0.0  ;;  %v442_v12 = vadd.f32 %v1010_v31, %v441_v7  ;;  %v761_v13 = vpop.f32.mrb[11].mxu1 }
  0xf0   :  { %569 = vst [vmem:[%s1211_s3 + $0x20] sm:$0xff] %v520_v8  ;;  %v521_v14 = vmax.f32 %v338_v9, 0.0  ;;  %595 = vst [vmem:[%s1211_s3 + $0xf0] sm:$0xff] %v546_v11  ;;  %v547_v15 = vmax.f32 %v442_v12, 0.0 }
  0xf2   :  { %570 = vst [vmem:[%s1211_s3 + $0x28] sm:$0xff] %v521_v14  ;;  %596 = vst [vmem:[%s1211_s3 + $0xf8] sm:$0xff] %v547_v15 }
  0xf3   :  { %v342_v16 = vpop.f32.mrb[12].mxu0  ;;  %v446_v17 = vpop.f32.mrb[12].mxu1 }
  0xf4   :  { %v343_v18 = vadd.f32 %v1010_v31, %v342_v16  ;;  %v712_v19 = vpop.f32.mrb[13].mxu0  ;;  %v447_v20 = vadd.f32 %v1010_v31, %v446_v17  ;;  %v764_v21 = vpop.f32.mrb[13].mxu1 }
  0xf5   :  { %v345_v22 = vpop.f32.mrb[14].mxu0  ;;  %v449_v23 = vpop.f32.mrb[14].mxu1 }
  0xf6   :  { %v522_v24 = vmax.f32 %v343_v18, 0.0  ;;  %v346_v25 = vadd.f32 %v1010_v31, %v345_v22  ;;  %v713_v26 = vpop.f32.mrb[15].mxu0  ;;  %v548_v27 = vmax.f32 %v447_v20, 0.0  ;;  %v450_v28 = vadd.f32 %v1010_v31, %v449_v23  ;;  %v765_v29 = vpop.f32.mrb[15].mxu1 }
  0xf8   :  { %571 = vst [vmem:[%s1211_s3 + $0x30] sm:$0xff] %v522_v24  ;;  %v523_v30 = vmax.f32 %v346_v25, 0.0  ;;  %597 = vst [vmem:[%s1211_s3 + $0x100] sm:$0xff] %v548_v27  ;;  %v549_v32 = vmax.f32 %v450_v28, 0.0 }
  0xfa   :  { %572 = vst [vmem:[%s1211_s3 + $0x38] sm:$0xff] %v523_v30  ;;  %598 = vst [vmem:[%s1211_s3 + $0x108] sm:$0xff] %v549_v32 }
  0xfb   :  { %v350_v33 = vpop.f32.mrb[16].mxu0  ;;  %v454_v34 = vpop.f32.mrb[16].mxu1 }
  0xfc   :  { %v351_v35 = vadd.f32 %v1010_v31, %v350_v33  ;;  %v716_v36 = vpop.f32.mrb[17].mxu0  ;;  %v455_v37 = vadd.f32 %v1010_v31, %v454_v34  ;;  %v768_v38 = vpop.f32.mrb[17].mxu1 }
  0xfd   :  { %v353_v39 = vpop.f32.mrb[18].mxu0  ;;  %v457_v40 = vpop.f32.mrb[18].mxu1 }
  0xfe   :  { %v524_v41 = vmax.f32 %v351_v35, 0.0  ;;  %v354_v42 = vadd.f32 %v1010_v31, %v353_v39  ;;  %v717_v43 = vpop.f32.mrb[19].mxu0  ;;  %v550_v44 = vmax.f32 %v455_v37, 0.0  ;;  %v458_v45 = vadd.f32 %v1010_v31, %v457_v40  ;;  %v769_v46 = vpop.f32.mrb[19].mxu1 }
 0x100   :  { %573 = vst [vmem:[%s1211_s3 + $0x40] sm:$0xff] %v524_v41  ;;  %v525_v47 = vmax.f32 %v354_v42, 0.0  ;;  %599 = vst [vmem:[%s1211_s3 + $0x110] sm:$0xff] %v550_v44  ;;  %v551_v48 = vmax.f32 %v458_v45, 0.0 }
 0x102   :  { %574 = vst [vmem:[%s1211_s3 + $0x48] sm:$0xff] %v525_v47  ;;  %600 = vst [vmem:[%s1211_s3 + $0x118] sm:$0xff] %v551_v48 }
 0x103   :  { %v358_v49 = vpop.f32.mrb[20].mxu0  ;;  %v462_v50 = vpop.f32.mrb[20].mxu1 }
 0x104   :  { %v359_v51 = vadd.f32 %v1010_v31, %v358_v49  ;;  %v720_v52 = vpop.f32.mrb[21].mxu0  ;;  %v463_v53 = vadd.f32 %v1010_v31, %v462_v50  ;;  %v772_v54 = vpop.f32.mrb[21].mxu1 }
 0x105   :  { %v361_v55 = vpop.f32.mrb[22].mxu0  ;;  %v465_v56 = vpop.f32.mrb[22].mxu1 }
 0x106   :  { %v526_v57 = vmax.f32 %v359_v51, 0.0  ;;  %v362_v58 = vadd.f32 %v1010_v31, %v361_v55  ;;  %v721_v59 = vpop.f32.mrb[23].mxu0  ;;  %v552_v60 = vmax.f32 %v463_v53, 0.0  ;;  %v466_v61 = vadd.f32 %v1010_v31, %v465_v56  ;;  %v773_v62 = vpop.f32.mrb[23].mxu1 }
 0x108   :  { %575 = vst [vmem:[%s1211_s3 + $0x50] sm:$0xff] %v526_v57  ;;  %v527_v63 = vmax.f32 %v362_v58, 0.0  ;;  %601 = vst [vmem:[%s1211_s3 + $0x120] sm:$0xff] %v552_v60  ;;  %v553_v0 = vmax.f32 %v466_v61, 0.0 }
 0x10a   :  { %576 = vst [vmem:[%s1211_s3 + $0x58] sm:$0xff] %v527_v63  ;;  %602 = vst [vmem:[%s1211_s3 + $0x128] sm:$0xff] %v553_v0 }
 0x10b   :  { %v366_v1 = vpop.f32.mrb[24].mxu0  ;;  %v470_v2 = vpop.f32.mrb[24].mxu1 }
 0x10c   :  { %v367_v3 = vadd.f32 %v1010_v31, %v366_v1  ;;  %v724_v4 = vpop.f32.mrb[25].mxu0  ;;  %v471_v5 = vadd.f32 %v1010_v31, %v470_v2  ;;  %v776_v6 = vpop.f32.mrb[25].mxu1 }
 0x10d   :  { %v369_v7 = vpop.f32.mrb[26].mxu0  ;;  %v473_v8 = vpop.f32.mrb[26].mxu1 }
 0x10e   :  { %v528_v9 = vmax.f32 %v367_v3, 0.0  ;;  %v370_v10 = vadd.f32 %v1010_v31, %v369_v7  ;;  %v725_v11 = vpop.f32.mrb[27].mxu0  ;;  %v554_v12 = vmax.f32 %v471_v5, 0.0  ;;  %v474_v13 = vadd.f32 %v1010_v31, %v473_v8  ;;  %v777_v14 = vpop.f32.mrb[27].mxu1 }
 0x110   :  { %577 = vst [vmem:[%s1211_s3 + $0x60] sm:$0xff] %v528_v9  ;;  %v529_v15 = vmax.f32 %v370_v10, 0.0  ;;  %603 = vst [vmem:[%s1211_s3 + $0x130] sm:$0xff] %v554_v12  ;;  %v555_v16 = vmax.f32 %v474_v13, 0.0 }
 0x112   :  { %578 = vst [vmem:[%s1211_s3 + $0x68] sm:$0xff] %v529_v15  ;;  %604 = vst [vmem:[%s1211_s3 + $0x138] sm:$0xff] %v555_v16 }
 0x113   :  { %v374_v17 = vpop.f32.mrb[28].mxu0  ;;  %v478_v18 = vpop.f32.mrb[28].mxu1 }
 0x114   :  { %v375_v19 = vadd.f32 %v1010_v31, %v374_v17  ;;  %v728_v20 = vpop.f32.mrb[29].mxu0  ;;  %v479_v21 = vadd.f32 %v1010_v31, %v478_v18  ;;  %v780_v22 = vpop.f32.mrb[29].mxu1 }
 0x115   :  { %v377_v23 = vpop.f32.mrb[30].mxu0  ;;  %v481_v24 = vpop.f32.mrb[30].mxu1 }
 0x116   :  { %v530_v25 = vmax.f32 %v375_v19, 0.0  ;;  %v378_v26 = vadd.f32 %v1010_v31, %v377_v23  ;;  %v729_v27 = vpop.f32.mrb[31].mxu0  ;;  %v556_v28 = vmax.f32 %v479_v21, 0.0  ;;  %v482_v29 = vadd.f32 %v1010_v31, %v481_v24  ;;  %v781_v30 = vpop.f32.mrb[31].mxu1 }
 0x118   :  { %579 = vst [vmem:[%s1211_s3 + $0x70] sm:$0xff] %v530_v25  ;;  %v531_v32 = vmax.f32 %v378_v26, 0.0  ;;  %605 = vst [vmem:[%s1211_s3 + $0x140] sm:$0xff] %v556_v28  ;;  %v557_v33 = vmax.f32 %v482_v29, 0.0 }
 0x11a   :  { %580 = vst [vmem:[%s1211_s3 + $0x78] sm:$0xff] %v531_v32  ;;  %606 = vst [vmem:[%s1211_s3 + $0x148] sm:$0xff] %v557_v33 }
 0x11b   :  { %v382_v34 = vpop.f32.mrb[32].mxu0  ;;  %v486_v35 = vpop.f32.mrb[32].mxu1 }
 0x11c   :  { %v383_v36 = vadd.f32 %v1010_v31, %v382_v34  ;;  %v732_v37 = vpop.f32.mrb[33].mxu0  ;;  %v487_v38 = vadd.f32 %v1010_v31, %v486_v35  ;;  %v784_v39 = vpop.f32.mrb[33].mxu1 }
 0x11d   :  { %v385_v40 = vpop.f32.mrb[34].mxu0  ;;  %v489_v41 = vpop.f32.mrb[34].mxu1 }
 0x11e   :  { %v532_v42 = vmax.f32 %v383_v36, 0.0  ;;  %v386_v43 = vadd.f32 %v1010_v31, %v385_v40  ;;  %v733_v44 = vpop.f32.mrb[35].mxu0  ;;  %v558_v45 = vmax.f32 %v487_v38, 0.0  ;;  %v490_v46 = vadd.f32 %v1010_v31, %v489_v41  ;;  %v785_v47 = vpop.f32.mrb[35].mxu1 }
 0x120   :  { %581 = vst [vmem:[%s1211_s3 + $0x80] sm:$0xff] %v532_v42  ;;  %v533_v48 = vmax.f32 %v386_v43, 0.0  ;;  %607 = vst [vmem:[%s1211_s3 + $0x150] sm:$0xff] %v558_v45  ;;  %v559_v49 = vmax.f32 %v490_v46, 0.0 }
 0x122   :  { %582 = vst [vmem:[%s1211_s3 + $0x88] sm:$0xff] %v533_v48  ;;  %608 = vst [vmem:[%s1211_s3 + $0x158] sm:$0xff] %v559_v49 }
 0x123   :  { %v390_v50 = vpop.f32.mrb[36].mxu0  ;;  %v494_v51 = vpop.f32.mrb[36].mxu1 }
 0x124   :  { %v391_v52 = vadd.f32 %v1010_v31, %v390_v50  ;;  %v736_v53 = vpop.f32.mrb[37].mxu0  ;;  %v495_v54 = vadd.f32 %v1010_v31, %v494_v51  ;;  %v788_v55 = vpop.f32.mrb[37].mxu1 }
 0x125   :  { %v393_v56 = vpop.f32.mrb[38].mxu0  ;;  %v497_v57 = vpop.f32.mrb[38].mxu1 }
 0x126   :  { %v534_v58 = vmax.f32 %v391_v52, 0.0  ;;  %v394_v59 = vadd.f32 %v1010_v31, %v393_v56  ;;  %v737_v60 = vpop.f32.mrb[39].mxu0  ;;  %v560_v61 = vmax.f32 %v495_v54, 0.0  ;;  %v498_v62 = vadd.f32 %v1010_v31, %v497_v57  ;;  %v789_v63 = vpop.f32.mrb[39].mxu1 }
 0x128   :  { %583 = vst [vmem:[%s1211_s3 + $0x90] sm:$0xff] %v534_v58  ;;  %v535_v0 = vmax.f32 %v394_v59, 0.0  ;;  %609 = vst [vmem:[%s1211_s3 + $0x160] sm:$0xff] %v560_v61  ;;  %v561_v1 = vmax.f32 %v498_v62, 0.0 }
 0x12a   :  { %584 = vst [vmem:[%s1211_s3 + $0x98] sm:$0xff] %v535_v0  ;;  %610 = vst [vmem:[%s1211_s3 + $0x168] sm:$0xff] %v561_v1 }
 0x12b   :  { %v398_v2 = vpop.f32.mrb[40].mxu0  ;;  %v502_v3 = vpop.f32.mrb[40].mxu1 }
 0x12c   :  { %v399_v4 = vadd.f32 %v1010_v31, %v398_v2  ;;  %v740_v5 = vpop.f32.mrb[41].mxu0  ;;  %v503_v6 = vadd.f32 %v1010_v31, %v502_v3  ;;  %v792_v7 = vpop.f32.mrb[41].mxu1 }
 0x12d   :  { %v401_v8 = vpop.f32.mrb[42].mxu0  ;;  %v505_v9 = vpop.f32.mrb[42].mxu1 }
 0x12e   :  { %v536_v10 = vmax.f32 %v399_v4, 0.0  ;;  %v402_v11 = vadd.f32 %v1010_v31, %v401_v8  ;;  %v741_v12 = vpop.f32.mrb[43].mxu0  ;;  %v562_v13 = vmax.f32 %v503_v6, 0.0  ;;  %v506_v14 = vadd.f32 %v1010_v31, %v505_v9  ;;  %v793_v15 = vpop.f32.mrb[43].mxu1 }
 0x130   :  { %585 = vst [vmem:[%s1211_s3 + $0xa0] sm:$0xff] %v536_v10  ;;  %v537_v16 = vmax.f32 %v402_v11, 0.0  ;;  %611 = vst [vmem:[%s1211_s3 + $0x170] sm:$0xff] %v562_v13  ;;  %v563_v17 = vmax.f32 %v506_v14, 0.0 }
 0x132   :  { %586 = vst [vmem:[%s1211_s3 + $0xa8] sm:$0xff] %v537_v16  ;;  %612 = vst [vmem:[%s1211_s3 + $0x178] sm:$0xff] %v563_v17 }
 0x133   :  { %v406_v18 = vpop.f32.mrb[44].mxu0  ;;  %v510_v19 = vpop.f32.mrb[44].mxu1 }
 0x134   :  { %v407_v20 = vadd.f32 %v1010_v31, %v406_v18  ;;  %v744_v21 = vpop.f32.mrb[45].mxu0  ;;  %v511_v22 = vadd.f32 %v1010_v31, %v510_v19  ;;  %v796_v23 = vpop.f32.mrb[45].mxu1 }
 0x135   :  { %v409_v24 = vpop.f32.mrb[46].mxu0  ;;  %v513_v25 = vpop.f32.mrb[46].mxu1 }
 0x136   :  { %v538_v26 = vmax.f32 %v407_v20, 0.0  ;;  %v410_v27 = vadd.f32 %v1010_v31, %v409_v24  ;;  %v745_v28 = vpop.f32.mrb[47].mxu0  ;;  %v564_v29 = vmax.f32 %v511_v22, 0.0  ;;  %v797_v30 = vpop.f32.mrb[47].mxu1 }
 0x138   :  { %587 = vst [vmem:[%s1211_s3 + $0xb0] sm:$0xff] %v538_v26  ;;  %v539_v32 = vmax.f32 %v410_v27, 0.0  ;;  %613 = vst [vmem:[%s1211_s3 + $0x180] sm:$0xff] %v564_v29 }
 0x13a   :  { %588 = vst [vmem:[%s1211_s3 + $0xb8] sm:$0xff] %v539_v32 }
 0x13b   :  { %v414_v33 = vpop.f32.mrb[48].mxu0 }
 0x13c   :  { %v415_v34 = vadd.f32 %v1010_v31, %v414_v33  ;;  %v748_v35 = vpop.f32.mrb[49].mxu0 }
 0x13d   :  { %v417_v36 = vpop.f32.mrb[50].mxu0 }
 0x13e   :  { %v540_v37 = vmax.f32 %v415_v34, 0.0  ;;  %v418_v38 = vadd.f32 %v1010_v31, %v417_v36  ;;  %v749_v39 = vpop.f32.mrb[51].mxu0 }
 0x140   :  { %589 = vst [vmem:[%s1211_s3 + $0xc0] sm:$0xff] %v540_v37  ;;  %v541_v40 = vmax.f32 %v418_v38, 0.0 }
 0x142   :  { %590 = vst [vmem:[%s1211_s3 + $0xc8] sm:$0xff] %v541_v40 }

// kernel: mnist_encoder_forward.5
= control target key start
LH: loop header
LB: loop body
LE: loop exit
PB: predicated region body
PF: predicated region fallthrough
CT: control target
= control target key end

     0   :  { %vm2046_vm0 = vmmov 0   ;;  %s2599_s1 = inlined_call_operand.vmem [shape: bf16[1152,128], index: 1, kind: input, shape index: {}]   ;;  %s2600_s0 = inlined_call_operand.vmem [shape: bf16[98,1152], index: 0, kind: input, shape index: {}]   ;;  %s2601_s2 = inlined_call_operand.vmem [shape: f32[1,128], index: 2, kind: input, shape index: {}]   ;;  %s2602_s3 = inlined_call_operand.vmem [shape: f32[98,128], index: 3, kind: output, shape index: {}]  }
   0x1   :  { %v1886_v0 = vld [vmem:[%s2599_s1 + $0x40] sm:$0xff]   ;;  %v1888_v2 = vld [vmem:[%s2599_s1 + $0x48] sm:$0xff]   ;;  %v1890_v4 = vld [vmem:[%s2599_s1 + $0x50] sm:$0xff]  }
   0x2   :  { %v1887_v1 = vld [vmem:[%s2599_s1] sm:$0xff]   ;;  %1868 = vmatprep.subr.bf16.mxu1 %v1886_v0  ;;  %1577 = vmatprep.subr.bf16.mxu0 %v1886_v0  ;;  %v1889_v3 = vld [vmem:[%s2599_s1 + $0x8] sm:$0xff]   ;;  %v1891_v5 = vld [vmem:[%s2599_s1 + $0x10] sm:$0xff]  }
   0x3   :  { %1876 = vmatpush3.bf16.msra.mxu1 %v1887_v1  ;;  %1578 = vmatpush3.bf16.msra.mxu0 %v1887_v1  ;;  %v1892_v6 = vld [vmem:[%s2599_s1 + $0x58] sm:$0xff]   ;;  %v1894_v8 = vld [vmem:[%s2599_s1 + $0x60] sm:$0xff]   ;;  %v1896_v10 = vld [vmem:[%s2599_s1 + $0x68] sm:$0xff]  }
   0x4   :  { %1869 = vmatprep.subr.bf16.mxu1 %v1888_v2  ;;  %1579 = vmatprep.subr.bf16.mxu0 %v1888_v2  ;;  %v1893_v7 = vld [vmem:[%s2599_s1 + $0x18] sm:$0xff]   ;;  %v1895_v9 = vld [vmem:[%s2599_s1 + $0x20] sm:$0xff]   ;;  %v1897_v12 = vld [vmem:[%s2599_s1 + $0x28] sm:$0xff]  }
   0x5   :  { %v1904_v11 = vld [vmem:[%s2600_s0 + $0x124] ss:$36 sps:$4 sm:$0xff]   ;;  %v1898_v14 = vld [vmem:[%s2599_s1 + $0x70] sm:$0xff]   ;;  %v1900_v16 = vld [vmem:[%s2599_s1 + $0x78] sm:$0xff]  }
   0x6   :  { %v1908_v13 = vld [vmem:[%s2600_s0 + $0x4] ss:$36 sps:$4 sm:$0xff]   ;;  %1035 = vmatprep.mubr.bf16.mxu1 %v1904_v11  ;;  %v1899_v15 = vld [vmem:[%s2599_s1 + $0x30] sm:$0xff]   ;;  %v1901_v17 = vld [vmem:[%s2599_s1 + $0x38] sm:$0xff]  }
   0x7   :  { %1877 = vmatpush3.bf16.msra.mxu1 %v1889_v3  ;;  %1580 = vmatpush3.bf16.msra.mxu0 %v1889_v3  ;;  %v1905_v18 = vld [vmem:[%s2599_s1 + $0xc0] sm:$0xff]   ;;  %v1912_v24 = vld [vmem:[%s2599_s1 + $0xc8] sm:$0xff]   ;;  %v1916_v30 = vld [vmem:[%s2599_s1 + $0xd0] sm:$0xff]  }
   0x8   :  { %1870 = vmatprep.subr.bf16.mxu1 %v1890_v4  ;;  %1581 = vmatprep.subr.bf16.mxu0 %v1890_v4  ;;  %v1902_v19 = vld [vmem:[%s2600_s0 + $0x120] ss:$36 sps:$4 sm:$0xff]   ;;  %v1914_v25 = vld [vmem:[%s2599_s1 + $0x148] sm:$0xff]   ;;  %v1921_v31 = vld [vmem:[%s2599_s1 + $0x150] sm:$0xff]  }
   0x9   :  { %1003 = vmatprep.mubr.bf16.mxu0 %v1908_v13  ;;  %v1906_v20 = vld [vmem:[%s2600_s0] ss:$36 sps:$4 sm:$0xff]   ;;  %v1917_v26 = vld [vmem:[%s2600_s0 + $0x4c] ss:$36 sps:$4 sm:$0xff]   ;;  %v1923_v36 = vld [vmem:[%s2599_s1 + $0xd8] sm:$0xff]  }
   0xa   :  { %v1910_v21 = vld [vmem:[%s2599_s1 + $0x140] sm:$0xff]   ;;  %v1913_v27 = vld [vmem:[%s2599_s1 + $0x88] sm:$0xff]   ;;  %v1919_v32 = vld [vmem:[%s2599_s1 + $0x90] sm:$0xff]  }
   0xb   :  { %1878 = vmatpush3.bf16.msra.mxu1 %v1891_v5  ;;  %1582 = vmatpush3.bf16.msra.mxu0 %v1891_v5  ;;  %v1909_v22 = vld [vmem:[%s2599_s1 + $0x80] sm:$0xff]   ;;  %v1924_v28 = vld [vmem:[%s2600_s0 + $0x16c] ss:$36 sps:$4 sm:$0xff]   ;;  %v1928_v37 = vld [vmem:[%s2599_s1 + $0x158] sm:$0xff]  }
   0xc   :  { %1871 = vmatprep.subr.bf16.mxu1 %v1892_v6  ;;  %1583 = vmatprep.subr.bf16.mxu0 %v1892_v6  ;;  %v1911_v23 = vld [vmem:[%s2599_s1 + $0x100] sm:$0xff]   ;;  %v1915_v29 = vld [vmem:[%s2599_s1 + $0x108] sm:$0xff]   ;;  %v1922_v35 = vld [vmem:[%s2599_s1 + $0x110] sm:$0xff]  }
   0xd   :  { %v1920_v33 = vld [vmem:[%s2600_s0 + $0x48] ss:$36 sps:$4 sm:$0xff]   ;;  %v1926_v38 = vld [vmem:[%s2599_s1 + $0x98] sm:$0xff]   ;;  %v1930_v41 = vld [vmem:[%s2599_s1 + $0xe0] sm:$0xff]  }
   0xe   :  { %v1927_v34 = vld [vmem:[%s2600_s0 + $0x168] ss:$36 sps:$4 sm:$0xff]   ;;  %v1931_v39 = vld [vmem:[%s2600_s0 + $0x94] ss:$36 sps:$4 sm:$0xff]   ;;  %v1935_v43 = vld [vmem:[%s2599_s1 + $0x160] sm:$0xff]  }
   0xf   :  { %1879 = vmatpush3.bf16.msra.mxu1 %v1893_v7  ;;  %1584 = vmatpush3.bf16.msra.mxu0 %v1893_v7  ;;  %v1929_v40 = vld [vmem:[%s2599_s1 + $0x118] sm:$0xff]   ;;  %v75_v42 = vld [vmem:[%s2600_s0 + $0x1b0] sm:$0x11]  ;;  %v1933_v45 = vld [vmem:[%s2599_s1 + $0xa0] sm:$0xff]   ;;  %v2045_v7 = vmov 0.0  }
  0x10   :  { %1872 = vmatprep.subr.bf16.mxu1 %v1894_v8  ;;  %1585 = vmatprep.subr.bf16.mxu0 %v1894_v8  ;;  %v1497_v44 = vcombine.high %v75_v42, %v75_v42  ;;  %v1934_v46 = vld [vmem:[%s2600_s0 + $0x90] ss:$36 sps:$4 sm:$0xff]   ;;  %v1936_v47 = vld [vmem:[%s2599_s1 + $0x120] sm:$0xff]   ;;  %v1496_v48 = vcombine.low %v75_v42, %v75_v42  ;;  %v1937_v49 = vld [vmem:[%s2599_s1 + $0xe8] sm:$0xff]  }
  0x11   :  { %v1941_v50 = vld [vmem:[%s2599_s1 + $0x168] sm:$0xff]   ;;  %v1944_v52 = vld [vmem:[%s2600_s0 + $0xdc] ss:$36 sps:$4 sm:$0xff]   ;;  %v1943_v54 = vld [vmem:[%s2599_s1 + $0xf0] sm:$0xff]  }
  0x12   :  { %v1939_v51 = vld [vmem:[%s2599_s1 + $0xa8] sm:$0xff]   ;;  %v1948_v55 = vld [vmem:[%s2599_s1 + $0x170] sm:$0xff]   ;;  %v1947_v57 = vld [vmem:[%s2600_s0 + $0xd8] ss:$36 sps:$4 sm:$0xff]  }
  0x13   :  { %1880 = vmatpush3.bf16.msra.mxu1 %v1895_v9  ;;  %1586 = vmatpush3.bf16.msra.mxu0 %v1895_v9  ;;  %v1942_v53 = vld [vmem:[%s2599_s1 + $0x128] sm:$0xff]   ;;  %v1946_v56 = vld [vmem:[%s2599_s1 + $0xb0] sm:$0xff]   ;;  %v1950_v59 = vld [vmem:[%s2599_s1 + $0xf8] sm:$0xff]  }
  0x14   :  { %1873 = vmatprep.subr.bf16.mxu1 %v1896_v10  ;;  %1587 = vmatprep.subr.bf16.mxu0 %v1896_v10  ;;  %v1949_v58 = vld [vmem:[%s2599_s1 + $0x130] sm:$0xff]   ;;  %v1952_v60 = vld [vmem:[%s2599_s1 + $0x178] sm:$0xff]   ;;  %v1957_v0 = vld [vmem:[%s2599_s1 + $0x1c0] sm:$0xff]  }
  0x15   :  { %v1955_v61 = vld [vmem:[%s2600_s0 + $0xc] ss:$36 sps:$4 sm:$0xff]   ;;  %v1951_v62 = vld [vmem:[%s2599_s1 + $0xb8] sm:$0xff]   ;;  %v1961_v4 = vld [vmem:[%s2599_s1 + $0x180] sm:$0xff]  }
  0x16   :  { %v1956_v63 = vld [vmem:[%s2599_s1 + $0x138] sm:$0xff]   ;;  %v1953_v2 = vld [vmem:[%s2600_s0 + $0x8] ss:$36 sps:$4 sm:$0xff]   ;;  %v1958_v3 = vld [vmem:[%s2600_s0 + $0x10] ss:$36 sps:$4 sm:$0xff]  }
  0x17   :  { %1881 = vmatpush3.bf16.msra.mxu1 %v1897_v12  ;;  %1588 = vmatpush3.bf16.msra.mxu0 %v1897_v12  ;;  %v1960_v1 = vld [vmem:[%s2600_s0 + $0x14] ss:$36 sps:$4 sm:$0xff]   ;;  %v1962_v5 = vld [vmem:[%s2599_s1 + $0x200] sm:$0xff]   ;;  %v1965_v8 = vld [vmem:[%s2599_s1 + $0x1c8] sm:$0xff]  }
  0x18   :  { %1874 = vmatprep.subr.bf16.mxu1 %v1898_v14  ;;  %1589 = vmatprep.subr.bf16.mxu0 %v1898_v14  ;;  %v1963_v6 = vld [vmem:[%s2600_s0 + $0x54] ss:$36 sps:$4 sm:$0xff]   ;;  %v1967_v9 = vld [vmem:[%s2599_s1 + $0x188] sm:$0xff]   ;;  %v1968_v10 = vld [vmem:[%s2600_s0 + $0x5c] ss:$36 sps:$4 sm:$0xff]  }
  0x19   :  { %v1971_v11 = vld [vmem:[%s2599_s1 + $0x208] sm:$0xff]   ;;  %v1972_v12 = vld [vmem:[%s2599_s1 + $0x1d0] sm:$0xff]   ;;  %v1970_v14 = vld [vmem:[%s2600_s0 + $0x58] ss:$36 sps:$4 sm:$0xff]  }
  0x1a   :  { %v1966_v13 = vld [vmem:[%s2600_s0 + $0x50] ss:$36 sps:$4 sm:$0xff]   ;;  %v2014_v42 = vld [vmem:[%s2599_s1 + $0x1f8] sm:$0xff]  }
  0x1b   :  { %1882 = vmatpush3.bf16.msra.mxu1 %v1899_v15  ;;  %1590 = vmatpush3.bf16.msra.mxu0 %v1899_v15  ;;  %v1973_v15 = vld [vmem:[%s2600_s0 + $0x9c] ss:$36 sps:$4 sm:$0xff]  }
  0x1c   :  { %1875 = vmatprep.subr.bf16.mxu1 %v1900_v16  ;;  %1591 = vmatprep.subr.bf16.mxu0 %v1900_v16  ;;  %v1975_v16 = vld [vmem:[%s2599_s1 + $0x190] sm:$0xff]  }
  0x1f   :  { %1883 = vmatpush3.bf16.msra.mxu1 %v1901_v17  ;;  %1592 = vmatpush3.bf16.msra.mxu0 %v1901_v17  ;;  %v1977_v17 = vld [vmem:[%s2600_s0 + $0xa4] ss:$36 sps:$4 sm:$0xff]  }
  0x20   :  { %1635 = vmatprep.subr.bf16.mxu1 %v1905_v18  ;;  %1693 = vmatprep.subr.bf16.mxu0 %v1910_v21  ;;  %v1980_v18 = vld [vmem:[%s2599_s1 + $0x210] sm:$0xff]   ;;  %v1976_v21 = vld [vmem:[%s2600_s0 + $0x98] ss:$36 sps:$4 sm:$0xff]  }
  0x22   :  { %1036 = vmatmul.mubr.bf16.vlgmr.msra.gmra.mrb[0].mxu1 %v1902_v19  ;;  %1004 = vmatmul.mubr.bf16.vlgmr.msra.gmra.mrb[0].mxu0 %v1906_v20  ;;  %v1981_v19 = vld [vmem:[%s2599_s1 + $0x1d8] sm:$0xff]  }
  0x23   :  { %1636 = vmatpush3.bf16.msra.mxu1 %v1909_v22  ;;  %1694 = vmatpush3.bf16.msra.mxu0 %v1911_v23  ;;  %v1982_v20 = vld [vmem:[%s2599_s1 + $0x198] sm:$0xff]   ;;  %v1979_v22 = vld [vmem:[%s2600_s0 + $0xa0] ss:$36 sps:$4 sm:$0xff]  }
  0x24   :  { %1637 = vmatprep.subr.bf16.mxu1 %v1912_v24  ;;  %1695 = vmatprep.subr.bf16.mxu0 %v1914_v25  ;;  %v1983_v23 = vld [vmem:[%s2600_s0 + $0xe4] ss:$36 sps:$4 sm:$0xff]   ;;  %v1986_v24 = vld [vmem:[%s2600_s0 + $0xec] ss:$36 sps:$4 sm:$0xff]   ;;  %v1989_v25 = vld [vmem:[%s2599_s1 + $0x218] sm:$0xff]  }
  0x25   :  { %1011 = vmatprep.mubr.bf16.mxu0 %v1917_v26  ;;  %1043 = vmatprep.mubr.bf16.mxu1 %v1924_v28  ;;  %v1990_v26 = vld [vmem:[%s2599_s1 + $0x1e0] sm:$0xff]  }
  0x26   :  { %v1985_v28 = vld [vmem:[%s2600_s0 + $0xe0] ss:$36 sps:$4 sm:$0xff]  }
  0x27   :  { %1638 = vmatpush3.bf16.msra.mxu1 %v1913_v27  ;;  %1696 = vmatpush3.bf16.msra.mxu0 %v1915_v29  ;;  %v1991_v27 = vld [vmem:[%s2599_s1 + $0x1a0] sm:$0xff]   ;;  %v1988_v29 = vld [vmem:[%s2600_s0 + $0xe8] ss:$36 sps:$4 sm:$0xff]  }
  0x28   :  { %1639 = vmatprep.subr.bf16.mxu1 %v1916_v30  ;;  %1697 = vmatprep.subr.bf16.mxu0 %v1921_v31  ;;  %v1998_v30 = vld [vmem:[%s2599_s1 + $0x220] sm:$0xff]   ;;  %v1999_v31 = vld [vmem:[%s2599_s1 + $0x1e8] sm:$0xff]  }
  0x2a   :  { %1012 = vmatmul.mubr.bf16.gmra.mrb[4].mxu0 %v1920_v33  ;;  %1044 = vmatmul.mubr.bf16.gmra.mrb[4].mxu1 %v1927_v34  ;;  %v1992_v33 = vld [vmem:[%s2600_s0 + $0x12c] ss:$36 sps:$4 sm:$0xff]   ;;  %v1995_v34 = vld [vmem:[%s2600_s0 + $0x134] ss:$36 sps:$4 sm:$0xff]  }
  0x2b   :  { %1640 = vmatpush3.bf16.msra.mxu1 %v1919_v32  ;;  %1698 = vmatpush3.bf16.msra.mxu0 %v1922_v35  ;;  %v2000_v32 = vld [vmem:[%s2599_s1 + $0x1a8] sm:$0xff]  }
  0x2c   :  { %1641 = vmatprep.subr.bf16.mxu1 %v1923_v36  ;;  %1699 = vmatprep.subr.bf16.mxu0 %v1928_v37  ;;  %v2006_v35 = vld [vmem:[%s2599_s1 + $0x228] sm:$0xff]   ;;  %v2008_v36 = vld [vmem:[%s2599_s1 + $0x1f0] sm:$0xff]  }
  0x2d   :  { %1019 = vmatprep.mubr.bf16.mxu0 %v1931_v39  ;;  %1051 = vmatprep.mubr.bf16.mxu1 %v1497_v44  ;;  %v1994_v37 = vld [vmem:[%s2600_s0 + $0x128] ss:$36 sps:$4 sm:$0xff]   ;;  %v2009_v39 = vld [vmem:[%s2599_s1 + $0x1b0] sm:$0xff]   ;;  %v2016_v44 = vld [vmem:[%s2599_s1 + $0x1b8] sm:$0xff]  }
  0x2f   :  { %1642 = vmatpush3.bf16.msra.mxu1 %v1926_v38  ;;  %1700 = vmatpush3.bf16.msra.mxu0 %v1929_v40  ;;  %v1997_v38 = vld [vmem:[%s2600_s0 + $0x130] ss:$36 sps:$4 sm:$0xff]  }
  0x30   :  { %1643 = vmatprep.subr.bf16.mxu1 %v1930_v41  ;;  %1701 = vmatprep.subr.bf16.mxu0 %v1935_v43  ;;  %v2001_v40 = vld [vmem:[%s2600_s0 + $0x174] ss:$36 sps:$4 sm:$0xff]   ;;  %v2004_v43 = vld [vmem:[%s2600_s0 + $0x17c] ss:$36 sps:$4 sm:$0xff]  }
  0x31   :  { %v2012_v41 = vld [vmem:[%s2599_s1 + $0x230] sm:$0xff]  }
  0x32   :  { %1020 = vmatmul.mubr.bf16.gmra.mrb[8].mxu0 %v1934_v46  ;;  %1052 = vmatmul.mubr.bf16.gmra.mrb[8].mxu1 %v1496_v48  ;;  %v76_v46 = vld [vmem:[%s2600_s0 + $0x1b8] sm:$0x11]  ;;  %v2003_v48 = vld [vmem:[%s2600_s0 + $0x170] ss:$36 sps:$4 sm:$0xff]  }
  0x33   :  { %1644 = vmatpush3.bf16.msra.mxu1 %v1933_v45  ;;  %1702 = vmatpush3.bf16.msra.mxu0 %v1936_v47  ;;  %v2020_v45 = vld [vmem:[%s2599_s1 + $0x238] sm:$0xff]   ;;  %v77_v47 = vld [vmem:[%s2600_s0 + $0x1c0] sm:$0x11] }
  0x34   :  { %1645 = vmatprep.subr.bf16.mxu1 %v1937_v49  ;;  %1703 = vmatprep.subr.bf16.mxu0 %v1941_v50  ;;  %v2007_v49 = vld [vmem:[%s2600_s0 + $0x178] ss:$36 sps:$4 sm:$0xff]   ;;  %v1499_v50 = vcombine.high %v76_v46, %v76_v46 }
  0x35   :  { %1027 = vmatprep.mubr.bf16.mxu0 %v1944_v52  ;;  %1091 = vmatprep.mubr.bf16.mxu1 %v1955_v61  ;;  %v1498_v52 = vcombine.low %v76_v46, %v76_v46  ;;  %v2028_v61 = vld [vmem:[%s2600_s0 + $0xa8] ss:$36 sps:$4 sm:$0xff]  }
  0x37   :  { %1646 = vmatpush3.bf16.msra.mxu1 %v1939_v51  ;;  %1704 = vmatpush3.bf16.msra.mxu0 %v1942_v53  ;;  %v1501_v51 = vcombine.high %v77_v47, %v77_v47  ;;  %v1500_v53 = vcombine.low %v77_v47, %v77_v47 }
  0x38   :  { %1647 = vmatprep.subr.bf16.mxu1 %v1943_v54  ;;  %1705 = vmatprep.subr.bf16.mxu0 %v1948_v55  ;;  %v2019_v54 = vld [vmem:[%s2600_s0 + $0x1c] ss:$36 sps:$4 sm:$0xff]  }
  0x39   :  { %v2017_v55 = vld [vmem:[%s2600_s0 + $0x18] ss:$36 sps:$4 sm:$0xff]  }
  0x3a   :  { %1028 = vmatmul.mubr.bf16.gmra.mrb[12].mxu0 %v1947_v57  ;;  %v2022_v57 = vld [vmem:[%s2600_s0 + $0x64] ss:$36 sps:$4 sm:$0xff]  }
  0x3b   :  { %1648 = vmatpush3.bf16.msra.mxu1 %v1946_v56  ;;  %1706 = vmatpush3.bf16.msra.mxu0 %v1949_v58  ;;  %v2021_v56 = vld [vmem:[%s2600_s0 + $0x20] ss:$36 sps:$4 sm:$0xff]  }
  0x3c   :  { %1649 = vmatprep.subr.bf16.mxu1 %v1950_v59  ;;  %1707 = vmatprep.subr.bf16.mxu0 %v1952_v60  ;;  %v2024_v58 = vld [vmem:[%s2600_s0 + $0x60] ss:$36 sps:$4 sm:$0xff]   ;;  %v2025_v59 = vld [vmem:[%s2600_s0 + $0x68] ss:$36 sps:$4 sm:$0xff]  }
  0x3d   :  { %1179 = vmatprep.mubr.bf16.mxu0 %v1960_v1  ;;  %v2026_v60 = vld [vmem:[%s2600_s0 + $0xac] ss:$36 sps:$4 sm:$0xff]   ;;  %v2033_v1 = vld [vmem:[%s2600_s0 + $0xf8] ss:$36 sps:$4 sm:$0xff]  }
  0x3f   :  { %1650 = vmatpush3.bf16.msra.mxu1 %v1951_v62  ;;  %1708 = vmatpush3.bf16.msra.mxu0 %v1956_v63  ;;  %v2029_v62 = vld [vmem:[%s2600_s0 + $0xb0] ss:$36 sps:$4 sm:$0xff]  }
  0x40   :  { %1751 = vmatprep.subr.bf16.mxu1 %v1957_v0  ;;  %1824 = vmatprep.subr.bf16.mxu0 %v2045_v7  ;;  %v2030_v63 = vld [vmem:[%s2600_s0 + $0xf4] ss:$36 sps:$4 sm:$0xff]  }
  0x41   :  { %v2032_v0 = vld [vmem:[%s2600_s0 + $0xf0] ss:$36 sps:$4 sm:$0xff]  }
  0x42   :  { %1092 = vmatmul.mubr.bf16.vlgmr.msra.gmra.mrb[12].mxu1 %v1953_v2  ;;  %1180 = vmatmul.mubr.bf16.vlgmr.msra.gmra.mrb[16].mxu0 %v1958_v3  ;;  %v2034_v2 = vld [vmem:[%s2600_s0 + $0x13c] ss:$36 sps:$4 sm:$0xff]  }
  0x43   :  { %1752 = vmatpush3.bf16.msra.mxu1 %v1961_v4  ;;  %1825 = vmatpush3.bf16.msra.mxu0 %v1962_v5  ;;  %v2036_v3 = vld [vmem:[%s2600_s0 + $0x138] ss:$36 sps:$4 sm:$0xff]   ;;  %v2037_v4 = vld [vmem:[%s2600_s0 + $0x140] ss:$36 sps:$4 sm:$0xff]  }
  0x44   :  { %1099 = vmatprep.mubr.bf16.mxu1 %v1963_v6  ;;  %1753 = vmatprep.subr.bf16.mxu1 %v1965_v8  ;;  %v2038_v5 = vld [vmem:[%s2600_s0 + $0x184] ss:$36 sps:$4 sm:$0xff]  }
  0x45   :  { %1187 = vmatprep.mubr.bf16.mxu0 %v1968_v10  ;;  %1826 = vmatprep.subr.bf16.mxu0 %v2045_v7  ;;  %v78_v6 = vld [vmem:[%s2600_s0 + $0x1c8] sm:$0x11]  ;;  %v2040_v8 = vld [vmem:[%s2600_s0 + $0x180] ss:$36 sps:$4 sm:$0xff]  }
  0x46   :  { %v1503_v10 = vcombine.high %v78_v6, %v78_v6 }
  0x47   :  { %1754 = vmatpush3.bf16.msra.mxu1 %v1967_v9  ;;  %1827 = vmatpush3.bf16.msra.mxu0 %v1971_v11  ;;  %v2041_v9 = vld [vmem:[%s2600_s0 + $0x188] ss:$36 sps:$4 sm:$0xff]   ;;  %v1502_v11 = vcombine.low %v78_v6, %v78_v6 }
  0x48   :  { %1755 = vmatprep.subr.bf16.mxu1 %v1972_v12  ;;  %1828 = vmatprep.subr.bf16.mxu0 %v2045_v7  ;;  %v2044_v12 = vld [vmem:[%s2600_s0 + $0x1d0] ss:$0 sps:$4 sm:$0x11]  }
  0x4a   :  { %1100 = vmatmul.mubr.bf16.gmra.mrb[16].mxu1 %v1966_v13  ;;  %1188 = vmatmul.mubr.bf16.gmra.mrb[20].mxu0 %v1970_v14 }
  0x4b   :  { %1107 = vmatprep.mubr.bf16.mxu1 %v1973_v15  ;;  %1756 = vmatpush3.bf16.msra.mxu1 %v1975_v16 }
  0x4c   :  { %1195 = vmatprep.mubr.bf16.mxu0 %v1977_v17  ;;  %1829 = vmatpush3.bf16.msra.mxu0 %v1980_v18 }
  0x4d   :  { %1757 = vmatprep.subr.bf16.mxu1 %v1981_v19  ;;  %1830 = vmatprep.subr.bf16.mxu0 %v2045_v7 }
  0x4f   :  { %1758 = vmatpush3.bf16.msra.mxu1 %v1982_v20 }
  0x50   :  { %1831 = vmatpush3.bf16.msra.mxu0 %v1989_v25  ;;  %1759 = vmatprep.subr.bf16.mxu1 %v1990_v26 }
  0x51   :  { %1832 = vmatprep.subr.bf16.mxu0 %v2045_v7 }
  0x52   :  { %1108 = vmatmul.mubr.bf16.gmra.mrb[20].mxu1 %v1976_v21  ;;  %1196 = vmatmul.mubr.bf16.gmra.mrb[24].mxu0 %v1979_v22 }
  0x53   :  { %1115 = vmatprep.mubr.bf16.mxu1 %v1983_v23  ;;  %1203 = vmatprep.mubr.bf16.mxu0 %v1986_v24 }
  0x54   :  { %1760 = vmatpush3.bf16.msra.mxu1 %v1991_v27  ;;  %1833 = vmatpush3.bf16.msra.mxu0 %v1998_v30 }
  0x55   :  { %1761 = vmatprep.subr.bf16.mxu1 %v1999_v31  ;;  %1834 = vmatprep.subr.bf16.mxu0 %v2045_v7 }
  0x58   :  { %1762 = vmatpush3.bf16.msra.mxu1 %v2000_v32  ;;  %1835 = vmatpush3.bf16.msra.mxu0 %v2006_v35 }
  0x59   :  { %1763 = vmatprep.subr.bf16.mxu1 %v2008_v36  ;;  %1836 = vmatprep.subr.bf16.mxu0 %v2045_v7 }
  0x5a   :  { %1116 = vmatmul.mubr.bf16.gmra.mrb[24].mxu1 %v1985_v28  ;;  %1204 = vmatmul.mubr.bf16.gmra.mrb[28].mxu0 %v1988_v29 }
  0x5b   :  { %1123 = vmatprep.mubr.bf16.mxu1 %v1992_v33  ;;  %1211 = vmatprep.mubr.bf16.mxu0 %v1995_v34 }
  0x5c   :  { %1764 = vmatpush3.bf16.msra.mxu1 %v2009_v39  ;;  %1837 = vmatpush3.bf16.msra.mxu0 %v2012_v41 }
  0x5d   :  { %1765 = vmatprep.subr.bf16.mxu1 %v2014_v42  ;;  %1838 = vmatprep.subr.bf16.mxu0 %v2045_v7 }
  0x60   :  { %1766 = vmatpush3.bf16.msra.mxu1 %v2016_v44  ;;  %1839 = vmatpush3.bf16.msra.mxu0 %v2020_v45 }
  0x62   :  { %1124 = vmatmul.mubr.bf16.gmra.mrb[28].mxu1 %v1994_v37  ;;  %1212 = vmatmul.mubr.bf16.gmra.mrb[32].mxu0 %v1997_v38 }
  0x63   :  { %1131 = vmatprep.mubr.bf16.mxu1 %v2001_v40  ;;  %1219 = vmatprep.mubr.bf16.mxu0 %v2004_v43 }
  0x6a   :  { %1132 = vmatmul.mubr.bf16.gmra.mrb[32].mxu1 %v2003_v48  ;;  %1220 = vmatmul.mubr.bf16.gmra.mrb[36].mxu0 %v2007_v49 }
  0x6b   :  { %1139 = vmatprep.mubr.bf16.mxu1 %v1499_v50  ;;  %1227 = vmatprep.mubr.bf16.mxu0 %v1501_v51 }
  0x72   :  { %1140 = vmatmul.mubr.bf16.gmra.mrb[36].mxu1 %v1498_v52  ;;  %1228 = vmatmul.mubr.bf16.gmra.mrb[40].mxu0 %v1500_v53 }
  0x73   :  { %1267 = vmatprep.mubr.bf16.mxu1 %v2019_v54  ;;  %1840 = vmatprep.mubr.msk.bf16.mxu0 %vm2046_vm0, %v2045_v7 }
  0x7a   :  { %1268 = vmatmul.mubr.bf16.vlgmr.msra.gmra.mrb[40].mxu1 %v2017_v55  ;;  %1841 = vmatmul.mubr.bf16.vlgmr.msra.gmra.mrb[44].mxu0 %v2021_v56  ;;  %v2499_v55 = vld [vmem:[%s2601_s2] ss:$0 sm:$0xff] }
  0x7b   :  { %1275 = vmatprep.mubr.bf16.mxu1 %v2022_v57  ;;  %1844 = vmatprep.mubr.msk.bf16.mxu0 %vm2046_vm0, %v2045_v7 }
  0x82   :  { %1276 = vmatmul.mubr.bf16.gmra.mrb[44].mxu1 %v2024_v58  ;;  %1845 = vmatmul.mubr.bf16.gmra.mrb[48].mxu0 %v2025_v59 }
  0x83   :  { %1283 = vmatprep.mubr.bf16.mxu1 %v2026_v60  ;;  %1848 = vmatprep.mubr.msk.bf16.mxu0 %vm2046_vm0, %v2045_v7 }
  0x8a   :  { %1284 = vmatmul.mubr.bf16.gmra.mrb[48].mxu1 %v2028_v61  ;;  %1849 = vmatmul.mubr.bf16.gmra.mrb[52].mxu0 %v2029_v62 }
  0x8b   :  { %1291 = vmatprep.mubr.bf16.mxu1 %v2030_v63  ;;  %1852 = vmatprep.mubr.msk.bf16.mxu0 %vm2046_vm0, %v2045_v7 }
  0x92   :  { %1292 = vmatmul.mubr.bf16.gmra.mrb[52].mxu1 %v2032_v0  ;;  %1853 = vmatmul.mubr.bf16.gmra.mrb[56].mxu0 %v2033_v1 }
  0x93   :  { %1299 = vmatprep.mubr.bf16.mxu1 %v2034_v2  ;;  %1856 = vmatprep.mubr.msk.bf16.mxu0 %vm2046_vm0, %v2045_v7 }
  0x9a   :  { %1300 = vmatmul.mubr.bf16.gmra.mrb[56].mxu1 %v2036_v3  ;;  %1857 = vmatmul.mubr.bf16.gmra.mrb[60].mxu0 %v2037_v4 }
  0x9b   :  { %1307 = vmatprep.mubr.bf16.mxu1 %v2038_v5  ;;  %1860 = vmatprep.mubr.msk.bf16.mxu0 %vm2046_vm0, %v2045_v7 }
  0xa2   :  { %1308 = vmatmul.mubr.bf16.gmra.mrb[60].mxu1 %v2040_v8  ;;  %1861 = vmatmul.mubr.bf16.gmra.mrb[64].mxu0 %v2041_v9 }
  0xa3   :  { %1315 = vmatprep.mubr.bf16.mxu1 %v1503_v10  ;;  %1864 = vmatprep.mubr.msk.bf16.mxu0 %vm2046_vm0, %v2045_v7 }
  0xaa   :  { %1316 = vmatmul.mubr.bf16.gmra.mrb[64].mxu1 %v1502_v11  ;;  %1865 = vmatmul.mubr.bf16.gmra.mrb[68].mxu0 %v2044_v12 }
  0xf5   :  { %v1617_v13 = vpop.f32.mrb[0].mxu1  ;;  %v1593_v14 = vpop.f32.mrb[0].mxu0 }
  0xf6   :  { %v1618_v15 = vpop.f32.mrb[1].mxu1  ;;  %v1594_v16 = vpop.f32.mrb[1].mxu0 }
  0xf7   :  { %v2482_v17 = vadd.f32 %v1618_v15, %v1617_v13  ;;  %v1620_v18 = vpop.f32.mrb[2].mxu1  ;;  %v1595_v19 = vadd.f32 %v1594_v16, %v1593_v14  ;;  %v1596_v20 = vpop.f32.mrb[2].mxu0 }
  0xf8   :  { %v1621_v21 = vpop.f32.mrb[3].mxu1  ;;  %v1597_v22 = vpop.f32.mrb[3].mxu0 }
  0xf9   :  { %v2484_v23 = vadd.f32 %v1621_v21, %v1620_v18  ;;  %v1598_v7 = vadd.f32 %v1597_v22, %v1596_v20  ;;  %v1006_v58 = vadd.f32 %v1595_v19, %v2499_v55 }
  0xfb   :  { %v1009_v1 = vadd.f32 %v1598_v7, %v2499_v55 }
  0xfd   :  { %v1599_v24 = vpop.f32.mrb[4].mxu0  ;;  %v1623_v25 = vpop.f32.mrb[4].mxu1 }
  0xfe   :  { %v1600_v26 = vpop.f32.mrb[5].mxu0  ;;  %v1624_v27 = vpop.f32.mrb[5].mxu1 }
  0xff   :  { %v1601_v28 = vadd.f32 %v1600_v26, %v1599_v24  ;;  %v1602_v29 = vpop.f32.mrb[6].mxu0  ;;  %v2486_v30 = vadd.f32 %v1624_v27, %v1623_v25  ;;  %v1626_v31 = vpop.f32.mrb[6].mxu1 }
 0x100   :  { %v1603_v32 = vpop.f32.mrb[7].mxu0  ;;  %v1627_v33 = vpop.f32.mrb[7].mxu1 }
 0x101   :  { %v1604_v34 = vadd.f32 %v1603_v32, %v1602_v29  ;;  %v2488_v35 = vadd.f32 %v1627_v33, %v1626_v31  ;;  %v1014_v13 = vadd.f32 %v1601_v28, %v2499_v55 }
 0x103   :  { %v1017_v21 = vadd.f32 %v1604_v34, %v2499_v55 }
 0x105   :  { %v1605_v36 = vpop.f32.mrb[8].mxu0  ;;  %v1629_v37 = vpop.f32.mrb[8].mxu1 }
 0x106   :  { %v1606_v38 = vpop.f32.mrb[9].mxu0  ;;  %v1630_v39 = vpop.f32.mrb[9].mxu1 }
 0x107   :  { %v1607_v40 = vadd.f32 %v1606_v38, %v1605_v36  ;;  %v1608_v41 = vpop.f32.mrb[10].mxu0  ;;  %v2490_v42 = vadd.f32 %v1630_v39, %v1629_v37  ;;  %v1632_v43 = vpop.f32.mrb[10].mxu1 }
 0x108   :  { %v1609_v44 = vpop.f32.mrb[11].mxu0  ;;  %v1633_v45 = vpop.f32.mrb[11].mxu1 }
 0x109   :  { %v1610_v46 = vadd.f32 %v1609_v44, %v1608_v41  ;;  %v1022_v33 = vadd.f32 %v1607_v40, %v2499_v55 }
 0x10b   :  { %v1025_v43 = vadd.f32 %v1610_v46, %v2499_v55 }
 0x10d   :  { %v1611_v47 = vpop.f32.mrb[12].mxu0 }
 0x10e   :  { %v1612_v48 = vpop.f32.mrb[13].mxu0 }
 0x10f   :  { %v2492_v49 = vadd.f32 %v1612_v48, %v1611_v47  ;;  %v1614_v50 = vpop.f32.mrb[14].mxu0 }
 0x110   :  { %v1615_v51 = vpop.f32.mrb[15].mxu0 }
 0x111   :  { %v2494_v52 = vadd.f32 %v1615_v51, %v1614_v50 }
 0x115   :  { %v1651_v53 = vpop.f32.mrb[12].mxu1  ;;  %v1709_v54 = vpop.f32.mrb[16].mxu0 }
 0x116   :  { %v1652_v56 = vpop.f32.mrb[13].mxu1  ;;  %v1710_v57 = vpop.f32.mrb[17].mxu0 }
 0x117   :  { %v1653_v59 = vadd.f32 %v1652_v56, %v1651_v53  ;;  %v1654_v60 = vpop.f32.mrb[14].mxu1  ;;  %v1711_v61 = vadd.f32 %v1710_v57, %v1709_v54  ;;  %v1712_v62 = vpop.f32.mrb[18].mxu0  ;;  %v1030_v57 = vadd.f32 %v2492_v49, %v2499_v55 }
 0x118   :  { %v1655_v63 = vpop.f32.mrb[15].mxu1  ;;  %v1713_v0 = vpop.f32.mrb[19].mxu0 }
 0x119   :  { %v1094_v2 = vadd.f32 %v1653_v59, %v1006_v58  ;;  %v1656_v3 = vadd.f32 %v1655_v63, %v1654_v60  ;;  %v1714_v4 = vadd.f32 %v1713_v0, %v1712_v62  ;;  %v1033_v63 = vadd.f32 %v2494_v52, %v2499_v55 }
 0x11b   :  { %v1097_v5 = vadd.f32 %v1656_v3, %v1009_v1  ;;  %v2503_v6 = vadd.f32 %v1711_v61, %v1094_v2 }
 0x11d   :  { %v2505_v8 = vadd.f32 %v1714_v4, %v1097_v5  ;;  %v1657_v9 = vpop.f32.mrb[16].mxu1  ;;  %v1715_v10 = vpop.f32.mrb[20].mxu0 }
 0x11e   :  { %v1658_v11 = vpop.f32.mrb[17].mxu1  ;;  %v1716_v12 = vpop.f32.mrb[21].mxu0 }
 0x11f   :  { %v1659_v14 = vadd.f32 %v1658_v11, %v1657_v9  ;;  %v1660_v15 = vpop.f32.mrb[18].mxu1  ;;  %v1717_v16 = vadd.f32 %v1716_v12, %v1715_v10  ;;  %v1718_v18 = vpop.f32.mrb[22].mxu0  ;;  %v1038_v12 = vadd.f32 %v2482_v17, %v2499_v55 }
 0x120   :  { %v1661_v19 = vpop.f32.mrb[19].mxu1  ;;  %v1719_v20 = vpop.f32.mrb[23].mxu0 }
 0x121   :  { %v1102_v22 = vadd.f32 %v1659_v14, %v1014_v13  ;;  %v1662_v7 = vadd.f32 %v1661_v19, %v1660_v15  ;;  %v1720_v24 = vadd.f32 %v1719_v20, %v1718_v18  ;;  %v1041_v19 = vadd.f32 %v2484_v23, %v2499_v55 }
 0x123   :  { %v1105_v25 = vadd.f32 %v1662_v7, %v1017_v21  ;;  %v2509_v26 = vadd.f32 %v1717_v16, %v1102_v22 }
 0x125   :  { %v2511_v27 = vadd.f32 %v1720_v24, %v1105_v25  ;;  %v1663_v29 = vpop.f32.mrb[20].mxu1  ;;  %v1721_v31 = vpop.f32.mrb[24].mxu0 }
 0x126   :  { %v1664_v32 = vpop.f32.mrb[21].mxu1  ;;  %v1722_v28 = vpop.f32.mrb[25].mxu0 }
 0x127   :  { %v1665_v36 = vadd.f32 %v1664_v32, %v1663_v29  ;;  %v1666_v37 = vpop.f32.mrb[22].mxu1  ;;  %v1723_v38 = vadd.f32 %v1722_v28, %v1721_v31  ;;  %v1724_v39 = vpop.f32.mrb[26].mxu0  ;;  %v1046_v28 = vadd.f32 %v2486_v30, %v2499_v55 }
 0x128   :  { %v1667_v41 = vpop.f32.mrb[23].mxu1  ;;  %v1725_v34 = vpop.f32.mrb[27].mxu0 }
 0x129   :  { %v1110_v44 = vadd.f32 %v1665_v36, %v1022_v33  ;;  %v1668_v45 = vadd.f32 %v1667_v41, %v1666_v37  ;;  %v1726_v47 = vadd.f32 %v1725_v34, %v1724_v39  ;;  %v1049_v41 = vadd.f32 %v2488_v35, %v2499_v55 }
 0x12b   :  { %v1113_v48 = vadd.f32 %v1668_v45, %v1025_v43  ;;  %v2515_v50 = vadd.f32 %v1723_v38, %v1110_v44 }
 0x12d   :  { %v2517_v51 = vadd.f32 %v1726_v47, %v1113_v48  ;;  %v1669_v53 = vpop.f32.mrb[24].mxu1  ;;  %v1727_v54 = vpop.f32.mrb[28].mxu0 }
 0x12e   :  { %v1670_v56 = vpop.f32.mrb[25].mxu1  ;;  %v1728_v40 = vpop.f32.mrb[29].mxu0 }
 0x12f   :  { %v1671_v58 = vadd.f32 %v1670_v56, %v1669_v53  ;;  %v1672_v59 = vpop.f32.mrb[26].mxu1  ;;  %v1729_v60 = vadd.f32 %v1728_v40, %v1727_v54  ;;  %v1730_v61 = vpop.f32.mrb[30].mxu0  ;;  %v1054_v40 = vadd.f32 %v2490_v42, %v2499_v55 }
 0x130   :  { %v1673_v46 = vpop.f32.mrb[27].mxu1  ;;  %v1731_v62 = vpop.f32.mrb[31].mxu0 }
 0x131   :  { %v1118_v0 = vadd.f32 %v1671_v58, %v1030_v57  ;;  %v1674_v1 = vadd.f32 %v1673_v46, %v1672_v59  ;;  %v1732_v2 = vadd.f32 %v1731_v62, %v1730_v61 }
 0x133   :  { %v1121_v3 = vadd.f32 %v1674_v1, %v1033_v63  ;;  %v2523_v4 = vadd.f32 %v1729_v60, %v1118_v0 }
 0x135   :  { %v2525_v5 = vadd.f32 %v1732_v2, %v1121_v3  ;;  %v1675_v9 = vpop.f32.mrb[28].mxu1  ;;  %v1733_v10 = vpop.f32.mrb[32].mxu0 }
 0x136   :  { %v1676_v49 = vpop.f32.mrb[29].mxu1  ;;  %v1734_v11 = vpop.f32.mrb[33].mxu0 }
 0x137   :  { %v1677_v13 = vadd.f32 %v1676_v49, %v1675_v9  ;;  %v1678_v14 = vpop.f32.mrb[30].mxu1  ;;  %v1735_v15 = vadd.f32 %v1734_v11, %v1733_v10  ;;  %v1736_v16 = vpop.f32.mrb[34].mxu0 }
 0x138   :  { %v1679_v52 = vpop.f32.mrb[31].mxu1  ;;  %v1737_v18 = vpop.f32.mrb[35].mxu0 }
 0x139   :  { %v1126_v20 = vadd.f32 %v1677_v13, %v1038_v12  ;;  %v1680_v21 = vadd.f32 %v1679_v52, %v1678_v14  ;;  %v1738_v22 = vadd.f32 %v1737_v18, %v1736_v16 }
 0x13b   :  { %v1129_v7 = vadd.f32 %v1680_v21, %v1041_v19  ;;  %v2531_v24 = vadd.f32 %v1735_v15, %v1126_v20 }
 0x13d   :  { %v2533_v25 = vadd.f32 %v1738_v22, %v1129_v7  ;;  %v1681_v29 = vpop.f32.mrb[32].mxu1  ;;  %v1739_v31 = vpop.f32.mrb[36].mxu0 }
 0x13e   :  { %v1682_v17 = vpop.f32.mrb[33].mxu1  ;;  %v1740_v32 = vpop.f32.mrb[37].mxu0 }
 0x13f   :  { %v1683_v33 = vadd.f32 %v1682_v17, %v1681_v29  ;;  %v1684_v36 = vpop.f32.mrb[34].mxu1  ;;  %v1741_v37 = vadd.f32 %v1740_v32, %v1739_v31  ;;  %v1742_v38 = vpop.f32.mrb[38].mxu0 }
 0x140   :  { %v1685_v23 = vpop.f32.mrb[35].mxu1  ;;  %v1743_v39 = vpop.f32.mrb[39].mxu0 }
 0x141   :  { %v1134_v34 = vadd.f32 %v1683_v33, %v1046_v28  ;;  %v1686_v43 = vadd.f32 %v1685_v23, %v1684_v36  ;;  %v1744_v44 = vadd.f32 %v1743_v39, %v1742_v38 }
 0x143   :  { %v1137_v45 = vadd.f32 %v1686_v43, %v1049_v41  ;;  %v2539_v47 = vadd.f32 %v1741_v37, %v1134_v34 }
 0x145   :  { %v2541_v48 = vadd.f32 %v1744_v44, %v1137_v45  ;;  %v1687_v53 = vpop.f32.mrb[36].mxu1  ;;  %v1745_v54 = vpop.f32.mrb[40].mxu0 }
 0x146   :  { %v1688_v30 = vpop.f32.mrb[37].mxu1  ;;  %v1746_v56 = vpop.f32.mrb[41].mxu0 }
 0x147   :  { %v1689_v57 = vadd.f32 %v1688_v30, %v1687_v53  ;;  %v1690_v58 = vpop.f32.mrb[38].mxu1  ;;  %v1747_v59 = vadd.f32 %v1746_v56, %v1745_v54  ;;  %v1748_v60 = vpop.f32.mrb[42].mxu0 }
 0x148   :  { %v1691_v35 = vpop.f32.mrb[39].mxu1  ;;  %v1749_v61 = vpop.f32.mrb[43].mxu0 }
 0x149   :  { %v1142_v46 = vadd.f32 %v1689_v57, %v1054_v40 }
 0x14b   :  { %v2545_v62 = vadd.f32 %v1747_v59, %v1142_v46 }
 0x14d   :  { %v1767_v63 = vpop.f32.mrb[40].mxu1  ;;  %v1357_v0 = vpop.f32.mrb[44].mxu0 }
 0x14e   :  { %v1768_v1 = vpop.f32.mrb[41].mxu1  ;;  %v1842_v2 = vpop.f32.mrb[45].mxu0 }
 0x14f   :  { %v1769_v3 = vadd.f32 %v1768_v1, %v1767_v63  ;;  %v1770_v9 = vpop.f32.mrb[42].mxu1  ;;  %v1360_v10 = vpop.f32.mrb[46].mxu0 }
 0x150   :  { %v1771_v49 = vpop.f32.mrb[43].mxu1  ;;  %v1843_v11 = vpop.f32.mrb[47].mxu0 }
 0x151   :  { %v1772_v12 = vadd.f32 %v1771_v49, %v1770_v9  ;;  %v1270_v42 = vadd.f32 %v1769_v3, %v2503_v6 }
 0x153   :  { %v1358_v55 = vadd.f32 %v1357_v0, %v1270_v42  ;;  %v1273_v13 = vadd.f32 %v1772_v12, %v2505_v8 }
 0x155   :  { %v1411_v14 = vmax.f32 %v1358_v55, 0.0  ;;  %v1361_v15 = vadd.f32 %v1360_v10, %v1273_v13  ;;  %v1773_v16 = vpop.f32.mrb[44].mxu1  ;;  %v1365_v52 = vpop.f32.mrb[48].mxu0 }
 0x156   :  { %v1774_v18 = vpop.f32.mrb[45].mxu1  ;;  %v1846_v19 = vpop.f32.mrb[49].mxu0 }
 0x157   :  { %1424 = vst [vmem:[%s2602_s3] sm:$0xff] %v1411_v14  ;;  %v1412_v20 = vmax.f32 %v1361_v15, 0.0  ;;  %v1775_v21 = vadd.f32 %v1774_v18, %v1773_v16  ;;  %v1776_v22 = vpop.f32.mrb[46].mxu1  ;;  %v1368_v7 = vpop.f32.mrb[50].mxu0 }
 0x158   :  { %v1777_v29 = vpop.f32.mrb[47].mxu1  ;;  %v1847_v31 = vpop.f32.mrb[51].mxu0 }
 0x159   :  { %1425 = vst [vmem:[%s2602_s3 + $0x8] sm:$0xff] %v1412_v20  ;;  %v1778_v6 = vadd.f32 %v1777_v29, %v1776_v22  ;;  %v1278_v8 = vadd.f32 %v1775_v21, %v2509_v26 }
 0x15b   :  { %v1366_v17 = vadd.f32 %v1365_v52, %v1278_v8  ;;  %v1281_v32 = vadd.f32 %v1778_v6, %v2511_v27 }
 0x15d   :  { %v1413_v28 = vmax.f32 %v1366_v17, 0.0  ;;  %v1369_v33 = vadd.f32 %v1368_v7, %v1281_v32  ;;  %v1779_v36 = vpop.f32.mrb[48].mxu1  ;;  %v1373_v37 = vpop.f32.mrb[52].mxu0 }
 0x15e   :  { %v1780_v38 = vpop.f32.mrb[49].mxu1  ;;  %v1850_v23 = vpop.f32.mrb[53].mxu0 }
 0x15f   :  { %1426 = vst [vmem:[%s2602_s3 + $0x10] sm:$0xff] %v1413_v28  ;;  %v1414_v39 = vmax.f32 %v1369_v33, 0.0  ;;  %v1781_v41 = vadd.f32 %v1780_v38, %v1779_v36  ;;  %v1782_v34 = vpop.f32.mrb[50].mxu1  ;;  %v1376_v43 = vpop.f32.mrb[54].mxu0 }
 0x160   :  { %v1783_v44 = vpop.f32.mrb[51].mxu1  ;;  %v1851_v45 = vpop.f32.mrb[55].mxu0 }
 0x161   :  { %1427 = vst [vmem:[%s2602_s3 + $0x18] sm:$0xff] %v1414_v39  ;;  %v1784_v26 = vadd.f32 %v1783_v44, %v1782_v34  ;;  %v1286_v27 = vadd.f32 %v1781_v41, %v2515_v50 }
 0x163   :  { %v1374_v53 = vadd.f32 %v1373_v37, %v1286_v27  ;;  %v1289_v54 = vadd.f32 %v1784_v26, %v2517_v51 }
 0x165   :  { %v1415_v30 = vmax.f32 %v1374_v53, 0.0  ;;  %v1377_v56 = vadd.f32 %v1376_v43, %v1289_v54  ;;  %v1785_v40 = vpop.f32.mrb[52].mxu1  ;;  %v1381_v57 = vpop.f32.mrb[56].mxu0 }
 0x166   :  { %v1786_v58 = vpop.f32.mrb[53].mxu1  ;;  %v1854_v59 = vpop.f32.mrb[57].mxu0 }
 0x167   :  { %1428 = vst [vmem:[%s2602_s3 + $0x20] sm:$0xff] %v1415_v30  ;;  %v1416_v60 = vmax.f32 %v1377_v56, 0.0  ;;  %v1787_v35 = vadd.f32 %v1786_v58, %v1785_v40  ;;  %v1788_v61 = vpop.f32.mrb[54].mxu1  ;;  %v1384_v46 = vpop.f32.mrb[58].mxu0 }
 0x168   :  { %v1789_v63 = vpop.f32.mrb[55].mxu1  ;;  %v1855_v0 = vpop.f32.mrb[59].mxu0 }
 0x169   :  { %1429 = vst [vmem:[%s2602_s3 + $0x28] sm:$0xff] %v1416_v60  ;;  %v1790_v50 = vadd.f32 %v1789_v63, %v1788_v61  ;;  %v1294_v51 = vadd.f32 %v1787_v35, %v2523_v4 }
 0x16b   :  { %v1382_v1 = vadd.f32 %v1381_v57, %v1294_v51  ;;  %v1297_v2 = vadd.f32 %v1790_v50, %v2525_v5 }
 0x16d   :  { %v1417_v3 = vmax.f32 %v1382_v1, 0.0  ;;  %v1385_v9 = vadd.f32 %v1384_v46, %v1297_v2  ;;  %v1791_v10 = vpop.f32.mrb[56].mxu1  ;;  %v1389_v49 = vpop.f32.mrb[60].mxu0 }
 0x16e   :  { %v1792_v11 = vpop.f32.mrb[57].mxu1  ;;  %v1858_v12 = vpop.f32.mrb[61].mxu0 }
 0x16f   :  { %1430 = vst [vmem:[%s2602_s3 + $0x30] sm:$0xff] %v1417_v3  ;;  %v1418_v42 = vmax.f32 %v1385_v9, 0.0  ;;  %v1793_v55 = vadd.f32 %v1792_v11, %v1791_v10  ;;  %v1794_v13 = vpop.f32.mrb[58].mxu1  ;;  %v1392_v14 = vpop.f32.mrb[62].mxu0 }
 0x170   :  { %v1795_v15 = vpop.f32.mrb[59].mxu1  ;;  %v1859_v16 = vpop.f32.mrb[63].mxu0 }
 0x171   :  { %1431 = vst [vmem:[%s2602_s3 + $0x38] sm:$0xff] %v1418_v42  ;;  %v1796_v4 = vadd.f32 %v1795_v15, %v1794_v13  ;;  %v1302_v5 = vadd.f32 %v1793_v55, %v2531_v24 }
 0x173   :  { %v1390_v52 = vadd.f32 %v1389_v49, %v1302_v5  ;;  %v1305_v18 = vadd.f32 %v1796_v4, %v2533_v25 }
 0x175   :  { %v1419_v19 = vmax.f32 %v1390_v52, 0.0  ;;  %v1393_v20 = vadd.f32 %v1392_v14, %v1305_v18  ;;  %v1797_v21 = vpop.f32.mrb[60].mxu1  ;;  %v1397_v22 = vpop.f32.mrb[64].mxu0 }
 0x176   :  { %v1798_v7 = vpop.f32.mrb[61].mxu1  ;;  %v1862_v29 = vpop.f32.mrb[65].mxu0 }
 0x177   :  { %1432 = vst [vmem:[%s2602_s3 + $0x40] sm:$0xff] %v1419_v19  ;;  %v1420_v31 = vmax.f32 %v1393_v20, 0.0  ;;  %v1799_v6 = vadd.f32 %v1798_v7, %v1797_v21  ;;  %v1800_v8 = vpop.f32.mrb[62].mxu1  ;;  %v1400_v17 = vpop.f32.mrb[66].mxu0 }
 0x178   :  { %v1801_v32 = vpop.f32.mrb[63].mxu1  ;;  %v1863_v28 = vpop.f32.mrb[67].mxu0 }
 0x179   :  { %1433 = vst [vmem:[%s2602_s3 + $0x48] sm:$0xff] %v1420_v31  ;;  %v1802_v24 = vadd.f32 %v1801_v32, %v1800_v8  ;;  %v1310_v25 = vadd.f32 %v1799_v6, %v2539_v47 }
 0x17b   :  { %v1398_v33 = vadd.f32 %v1397_v22, %v1310_v25  ;;  %v1313_v36 = vadd.f32 %v1802_v24, %v2541_v48 }
 0x17d   :  { %v1421_v37 = vmax.f32 %v1398_v33, 0.0  ;;  %v1401_v38 = vadd.f32 %v1400_v17, %v1313_v36  ;;  %v1803_v23 = vpop.f32.mrb[64].mxu1  ;;  %v1405_v39 = vpop.f32.mrb[68].mxu0 }
 0x17e   :  { %v1804_v41 = vpop.f32.mrb[65].mxu1  ;;  %v1866_v34 = vpop.f32.mrb[69].mxu0 }
 0x17f   :  { %1434 = vst [vmem:[%s2602_s3 + $0x50] sm:$0xff] %v1421_v37  ;;  %v1422_v43 = vmax.f32 %v1401_v38, 0.0  ;;  %v1805_v44 = vadd.f32 %v1804_v41, %v1803_v23  ;;  %v1806_v45 = vpop.f32.mrb[66].mxu1  ;;  %v1408_v26 = vpop.f32.mrb[70].mxu0 }
 0x180   :  { %v1807_v27 = vpop.f32.mrb[67].mxu1  ;;  %v1867_v53 = vpop.f32.mrb[71].mxu0 }
 0x181   :  { %1435 = vst [vmem:[%s2602_s3 + $0x58] sm:$0xff] %v1422_v43  ;;  %v1318_v47 = vadd.f32 %v1805_v44, %v2545_v62 }
 0x183   :  { %v1406_v48 = vadd.f32 %v1405_v39, %v1318_v47 }
 0x185   :  { %v1423_v54 = vmax.f32 %v1406_v48, 0.0 }
 0x187   :  { %1436 = vst [vmem:[%s2602_s3 + $0x60] sm:$0x3] %v1423_v54 }

// kernel: mnist_encoder_forward.6
= control target key start
LH: loop header
LB: loop body
LE: loop exit
PB: predicated region body
PF: predicated region fallthrough
CT: control target
= control target key end

     0   :  { %s1603_s1 = inlined_call_operand.vmem [shape: bf16[1152,128], index: 1, kind: input, shape index: {}]   ;;  %s1604_s0 = inlined_call_operand.vmem [shape: bf16[32,1152], index: 0, kind: input, shape index: {}]   ;;  %s1605_s2 = inlined_call_operand.vmem [shape: f32[1,128], index: 2, kind: input, shape index: {}]   ;;  %s1606_s3 = inlined_call_operand.vmem [shape: f32[32,128], index: 3, kind: output, shape index: {}]  }
   0x1   :  { %v1200_v0 = vld [vmem:[%s1603_s1 + $0x40] sm:$0xff]   ;;  %v1204_v4 = vld [vmem:[%s1603_s1 + $0x48] sm:$0xff]   ;;  %v1208_v8 = vld [vmem:[%s1603_s1 + $0x50] sm:$0xff]  }
   0x2   :  { %v1201_v1 = vld [vmem:[%s1603_s1] sm:$0xff]   ;;  %1058 = vmatprep.subr.bf16.mxu0 %v1200_v0  ;;  %v1205_v5 = vld [vmem:[%s1603_s1 + $0x8] sm:$0xff]   ;;  %v1209_v9 = vld [vmem:[%s1603_s1 + $0x10] sm:$0xff]  }
   0x3   :  { %v1202_v2 = vld [vmem:[%s1603_s1 + $0xc0] sm:$0xff]   ;;  %1059 = vmatpush3.bf16.msra.mxu0 %v1201_v1  ;;  %v1206_v6 = vld [vmem:[%s1603_s1 + $0xc8] sm:$0xff]   ;;  %v1210_v10 = vld [vmem:[%s1603_s1 + $0xd0] sm:$0xff]  }
   0x4   :  { %v1203_v3 = vld [vmem:[%s1603_s1 + $0x80] sm:$0xff]   ;;  %1086 = vmatprep.subr.bf16.mxu1 %v1202_v2  ;;  %1060 = vmatprep.subr.bf16.mxu0 %v1204_v4  ;;  %v1207_v7 = vld [vmem:[%s1603_s1 + $0x88] sm:$0xff]   ;;  %v1211_v11 = vld [vmem:[%s1603_s1 + $0x90] sm:$0xff]  }
   0x5   :  { %1087 = vmatpush3.bf16.msra.mxu1 %v1203_v3  ;;  %v1212_v12 = vld [vmem:[%s1603_s1 + $0x58] sm:$0xff]   ;;  %v1216_v16 = vld [vmem:[%s1603_s1 + $0x60] sm:$0xff]   ;;  %v1220_v20 = vld [vmem:[%s1603_s1 + $0x68] sm:$0xff]  }
   0x6   :  { %1088 = vmatprep.subr.bf16.mxu1 %v1206_v6  ;;  %v1213_v13 = vld [vmem:[%s1603_s1 + $0x18] sm:$0xff]   ;;  %v1217_v17 = vld [vmem:[%s1603_s1 + $0x20] sm:$0xff]   ;;  %v1221_v21 = vld [vmem:[%s1603_s1 + $0x28] sm:$0xff]  }
   0x7   :  { %1061 = vmatpush3.bf16.msra.mxu0 %v1205_v5  ;;  %v1214_v14 = vld [vmem:[%s1603_s1 + $0xd8] sm:$0xff]   ;;  %v1218_v18 = vld [vmem:[%s1603_s1 + $0xe0] sm:$0xff]   ;;  %v1222_v22 = vld [vmem:[%s1603_s1 + $0xe8] sm:$0xff]  }
   0x8   :  { %1062 = vmatprep.subr.bf16.mxu0 %v1208_v8  ;;  %v1215_v15 = vld [vmem:[%s1603_s1 + $0x98] sm:$0xff]   ;;  %v1219_v19 = vld [vmem:[%s1603_s1 + $0xa0] sm:$0xff]   ;;  %v1223_v23 = vld [vmem:[%s1603_s1 + $0xa8] sm:$0xff]  }
   0x9   :  { %1089 = vmatpush3.bf16.msra.mxu1 %v1207_v7  ;;  %v1224_v24 = vld [vmem:[%s1603_s1 + $0x70] sm:$0xff]   ;;  %v1228_v28 = vld [vmem:[%s1603_s1 + $0x78] sm:$0xff]   ;;  %v1231_v31 = vld [vmem:[%s1604_s0] ss:$36 sps:$4 sm:$0xff]  }
   0xa   :  { %1090 = vmatprep.subr.bf16.mxu1 %v1210_v10  ;;  %v1225_v25 = vld [vmem:[%s1603_s1 + $0x30] sm:$0xff]   ;;  %v1229_v29 = vld [vmem:[%s1603_s1 + $0x38] sm:$0xff]   ;;  %v1233_v32 = vld [vmem:[%s1604_s0 + $0x4] ss:$36 sps:$4 sm:$0xff]  }
   0xb   :  { %1063 = vmatpush3.bf16.msra.mxu0 %v1209_v9  ;;  %v1226_v26 = vld [vmem:[%s1603_s1 + $0xf0] sm:$0xff]   ;;  %v1230_v30 = vld [vmem:[%s1603_s1 + $0xf8] sm:$0xff]   ;;  %742 = vmatprep.mubr.bf16.mxu0 %v1233_v32  ;;  %v1235_v34 = vld [vmem:[%s1603_s1 + $0x140] sm:$0xff]  }
   0xc   :  { %1064 = vmatprep.subr.bf16.mxu0 %v1212_v12  ;;  %v1227_v27 = vld [vmem:[%s1603_s1 + $0xb0] sm:$0xff]   ;;  %v1234_v33 = vld [vmem:[%s1603_s1 + $0xb8] sm:$0xff]   ;;  %v1236_v35 = vld [vmem:[%s1604_s0 + $0x8] ss:$36 sps:$4 sm:$0xff]  }
   0xd   :  { %1091 = vmatpush3.bf16.msra.mxu1 %v1211_v11  ;;  %v1238_v36 = vld [vmem:[%s1604_s0 + $0xc] ss:$36 sps:$4 sm:$0xff]   ;;  %v1239_v37 = vld [vmem:[%s1603_s1 + $0x100] sm:$0xff]   ;;  %v1250_v48 = vld [vmem:[%s1603_s1 + $0x158] sm:$0xff]  }
   0xe   :  { %1092 = vmatprep.subr.bf16.mxu1 %v1214_v14  ;;  %791 = vmatprep.mubr.bf16.mxu1 %v1238_v36  ;;  %v1240_v38 = vld [vmem:[%s1603_s1 + $0x1c0] sm:$0xff]   ;;  %v1242_v40 = vld [vmem:[%s1603_s1 + $0x148] sm:$0xff]   ;;  %v1246_v44 = vld [vmem:[%s1603_s1 + $0x150] sm:$0xff]  }
   0xf   :  { %1065 = vmatpush3.bf16.msra.mxu0 %v1213_v13  ;;  %v1241_v39 = vld [vmem:[%s1603_s1 + $0x180] sm:$0xff]   ;;  %v1243_v41 = vld [vmem:[%s1603_s1 + $0x108] sm:$0xff]   ;;  %v1247_v45 = vld [vmem:[%s1603_s1 + $0x110] sm:$0xff]  }
  0x10   :  { %1066 = vmatprep.subr.bf16.mxu0 %v1216_v16  ;;  %v1244_v42 = vld [vmem:[%s1603_s1 + $0x1c8] sm:$0xff]   ;;  %v1248_v46 = vld [vmem:[%s1603_s1 + $0x1d0] sm:$0xff]   ;;  %v1251_v49 = vld [vmem:[%s1603_s1 + $0x118] sm:$0xff]  }
  0x11   :  { %1093 = vmatpush3.bf16.msra.mxu1 %v1215_v15  ;;  %v1245_v43 = vld [vmem:[%s1603_s1 + $0x188] sm:$0xff]   ;;  %v1249_v47 = vld [vmem:[%s1603_s1 + $0x190] sm:$0xff]   ;;  %v1252_v50 = vld [vmem:[%s1603_s1 + $0x1d8] sm:$0xff]  }
  0x12   :  { %1094 = vmatprep.subr.bf16.mxu1 %v1218_v18  ;;  %v1253_v51 = vld [vmem:[%s1603_s1 + $0x198] sm:$0xff]   ;;  %v1254_v52 = vld [vmem:[%s1603_s1 + $0x160] sm:$0xff]   ;;  %v1258_v56 = vld [vmem:[%s1603_s1 + $0x168] sm:$0xff]  }
  0x13   :  { %1067 = vmatpush3.bf16.msra.mxu0 %v1217_v17  ;;  %v1255_v53 = vld [vmem:[%s1603_s1 + $0x120] sm:$0xff]   ;;  %v1259_v57 = vld [vmem:[%s1604_s0 + $0x4c] ss:$36 sps:$4 sm:$0xff]   ;;  %v1264_v61 = vld [vmem:[%s1604_s0 + $0x54] ss:$36 sps:$4 sm:$0xff]  }
  0x14   :  { %1068 = vmatprep.subr.bf16.mxu0 %v1220_v20  ;;  %v1256_v54 = vld [vmem:[%s1603_s1 + $0x1e0] sm:$0xff]   ;;  %v1261_v58 = vld [vmem:[%s1603_s1 + $0x128] sm:$0xff]   ;;  %v1267_v63 = vld [vmem:[%s1604_s0 + $0x50] ss:$36 sps:$4 sm:$0xff]  }
  0x15   :  { %1095 = vmatpush3.bf16.msra.mxu1 %v1219_v19  ;;  %v1257_v55 = vld [vmem:[%s1603_s1 + $0x1a0] sm:$0xff]   ;;  %v1262_v59 = vld [vmem:[%s1604_s0 + $0x48] ss:$36 sps:$4 sm:$0xff]   ;;  %v1268_v0 = vld [vmem:[%s1603_s1 + $0x170] sm:$0xff]  }
  0x16   :  { %1096 = vmatprep.subr.bf16.mxu1 %v1222_v22  ;;  %v1263_v60 = vld [vmem:[%s1603_s1 + $0x1e8] sm:$0xff]   ;;  %v1269_v1 = vld [vmem:[%s1603_s1 + $0x130] sm:$0xff]   ;;  %v1272_v4 = vld [vmem:[%s1603_s1 + $0x178] sm:$0xff]  }
  0x17   :  { %1069 = vmatpush3.bf16.msra.mxu0 %v1221_v21  ;;  %v1266_v62 = vld [vmem:[%s1603_s1 + $0x1a8] sm:$0xff]   ;;  %v1270_v2 = vld [vmem:[%s1603_s1 + $0x1f0] sm:$0xff]   ;;  %v1273_v5 = vld [vmem:[%s1603_s1 + $0x138] sm:$0xff]  }
  0x18   :  { %1070 = vmatprep.subr.bf16.mxu0 %v1224_v24  ;;  %v1271_v3 = vld [vmem:[%s1603_s1 + $0x1b0] sm:$0xff]   ;;  %v1274_v6 = vld [vmem:[%s1603_s1 + $0x1f8] sm:$0xff]   ;;  %v1279_v10 = vld [vmem:[%s1603_s1 + $0x200] sm:$0xff]  }
  0x19   :  { %1097 = vmatpush3.bf16.msra.mxu1 %v1223_v23  ;;  %v1275_v7 = vld [vmem:[%s1604_s0 + $0x10] ss:$36 sps:$4 sm:$0xff]   ;;  %v1278_v9 = vld [vmem:[%s1603_s1 + $0x1b8] sm:$0xff]   ;;  %v1283_v13 = vld [vmem:[%s1603_s1 + $0x208] sm:$0xff]  }
  0x1a   :  { %1098 = vmatprep.subr.bf16.mxu1 %v1226_v26  ;;  %v1277_v8 = vld [vmem:[%s1604_s0 + $0x14] ss:$36 sps:$4 sm:$0xff]   ;;  %v1282_v12 = vld [vmem:[%s1604_s0 + $0x1c] ss:$36 sps:$4 sm:$0xff]   ;;  %v1288_v17 = vld [vmem:[%s1604_s0 + $0x64] ss:$36 sps:$4 sm:$0xff]  }
  0x1b   :  { %1071 = vmatpush3.bf16.msra.mxu0 %v1225_v25  ;;  %v1280_v11 = vld [vmem:[%s1604_s0 + $0x18] ss:$36 sps:$4 sm:$0xff]   ;;  %v1287_v16 = vld [vmem:[%s1603_s1 + $0x210] sm:$0xff]   ;;  %v1290_v18 = vld [vmem:[%s1604_s0 + $0x60] ss:$36 sps:$4 sm:$0xff]  }
  0x1c   :  { %1072 = vmatprep.subr.bf16.mxu0 %v1228_v28  ;;  %v1284_v14 = vld [vmem:[%s1604_s0 + $0x5c] ss:$36 sps:$4 sm:$0xff]   ;;  %v1293_v22 = vld [vmem:[%s1603_s1 + $0x228] sm:$0xff]   ;;  %v1294_v23 = vld [vmem:[%s1603_s1 + $0x230] sm:$0xff]  }
  0x1d   :  { %1099 = vmatpush3.bf16.msra.mxu1 %v1227_v27  ;;  %v1286_v15 = vld [vmem:[%s1604_s0 + $0x58] ss:$36 sps:$4 sm:$0xff]   ;;  %v1292_v20 = vld [vmem:[%s1603_s1 + $0x220] sm:$0xff]   ;;  %v1297_v25 = vld [vmem:[%s1604_s0 + $0x68] ss:$36 sps:$4 sm:$0xff]  }
  0x1e   :  { %1100 = vmatprep.subr.bf16.mxu1 %v1230_v30  ;;  %v1291_v19 = vld [vmem:[%s1603_s1 + $0x218] sm:$0xff]   ;;  %v1296_v21 = vld [vmem:[%s1604_s0 + $0x20] ss:$36 sps:$4 sm:$0xff]  }
  0x1f   :  { %1073 = vmatpush3.bf16.msra.mxu0 %v1229_v29  ;;  %v1295_v24 = vld [vmem:[%s1603_s1 + $0x238] sm:$0xff]   ;;  %v967_v27 = vld [vmem:[%s1605_s2] ss:$0 sm:$0xff] }
  0x20   :  { %1114 = vmatprep.subr.bf16.mxu0 %v1235_v34 }
  0x21   :  { %1101 = vmatpush3.bf16.msra.mxu1 %v1234_v33 }
  0x22   :  { %743 = vmatmul.mubr.bf16.vlgmr.msra.gmra.mrb[0].mxu0 %v1231_v31  ;;  %1142 = vmatprep.subr.bf16.mxu1 %v1240_v38 }
  0x23   :  { %1115 = vmatpush3.bf16.msra.mxu0 %v1239_v37  ;;  %750 = vmatprep.mubr.bf16.mxu0 %v1259_v57 }
  0x24   :  { %792 = vmatmul.mubr.bf16.vlgmr.msra.gmra.mrb[0].mxu1 %v1236_v35  ;;  %1116 = vmatprep.subr.bf16.mxu0 %v1242_v40 }
  0x25   :  { %1143 = vmatpush3.bf16.msra.mxu1 %v1241_v39  ;;  %799 = vmatprep.mubr.bf16.mxu1 %v1264_v61 }
  0x26   :  { %1144 = vmatprep.subr.bf16.mxu1 %v1244_v42 }
  0x27   :  { %1117 = vmatpush3.bf16.msra.mxu0 %v1243_v41 }
  0x28   :  { %1118 = vmatprep.subr.bf16.mxu0 %v1246_v44 }
  0x29   :  { %1145 = vmatpush3.bf16.msra.mxu1 %v1245_v43 }
  0x2a   :  { %1146 = vmatprep.subr.bf16.mxu1 %v1248_v46  ;;  %751 = vmatmul.mubr.bf16.gmra.mrb[4].mxu0 %v1262_v59 }
  0x2b   :  { %1119 = vmatpush3.bf16.msra.mxu0 %v1247_v45  ;;  %840 = vmatprep.mubr.bf16.mxu0 %v1277_v8 }
  0x2c   :  { %1120 = vmatprep.subr.bf16.mxu0 %v1250_v48  ;;  %800 = vmatmul.mubr.bf16.gmra.mrb[4].mxu1 %v1267_v63 }
  0x2d   :  { %1147 = vmatpush3.bf16.msra.mxu1 %v1249_v47  ;;  %889 = vmatprep.mubr.bf16.mxu1 %v1282_v12 }
  0x2e   :  { %1148 = vmatprep.subr.bf16.mxu1 %v1252_v50 }
  0x2f   :  { %1121 = vmatpush3.bf16.msra.mxu0 %v1251_v49 }
  0x30   :  { %1122 = vmatprep.subr.bf16.mxu0 %v1254_v52 }
  0x31   :  { %1149 = vmatpush3.bf16.msra.mxu1 %v1253_v51 }
  0x32   :  { %1150 = vmatprep.subr.bf16.mxu1 %v1256_v54 }
  0x33   :  { %1123 = vmatpush3.bf16.msra.mxu0 %v1255_v53 }
  0x34   :  { %1124 = vmatprep.subr.bf16.mxu0 %v1258_v56 }
  0x35   :  { %1151 = vmatpush3.bf16.msra.mxu1 %v1257_v55 }
  0x36   :  { %1152 = vmatprep.subr.bf16.mxu1 %v1263_v60 }
  0x37   :  { %1125 = vmatpush3.bf16.msra.mxu0 %v1261_v58 }
  0x38   :  { %1126 = vmatprep.subr.bf16.mxu0 %v1268_v0 }
  0x39   :  { %1153 = vmatpush3.bf16.msra.mxu1 %v1266_v62 }
  0x3a   :  { %1154 = vmatprep.subr.bf16.mxu1 %v1270_v2 }
  0x3b   :  { %1127 = vmatpush3.bf16.msra.mxu0 %v1269_v1 }
  0x3c   :  { %1128 = vmatprep.subr.bf16.mxu0 %v1272_v4 }
  0x3d   :  { %1155 = vmatpush3.bf16.msra.mxu1 %v1271_v3 }
  0x3e   :  { %1156 = vmatprep.subr.bf16.mxu1 %v1274_v6 }
  0x3f   :  { %1129 = vmatpush3.bf16.msra.mxu0 %v1273_v5 }
  0x40   :  { %1180 = vmatprep.subr.bf16.mxu0 %v1279_v10 }
  0x41   :  { %1157 = vmatpush3.bf16.msra.mxu1 %v1278_v9 }
  0x42   :  { %841 = vmatmul.mubr.bf16.vlgmr.msra.gmra.mrb[8].mxu0 %v1275_v7 }
  0x43   :  { %1181 = vmatpush3.bf16.msra.mxu0 %v1279_v10  ;;  %848 = vmatprep.mubr.bf16.mxu0 %v1284_v14 }
  0x44   :  { %890 = vmatmul.mubr.bf16.vlgmr.msra.gmra.mrb[8].mxu1 %v1280_v11  ;;  %1182 = vmatprep.subr.bf16.mxu0 %v1283_v13 }
  0x45   :  { %897 = vmatprep.mubr.bf16.mxu1 %v1288_v17 }
  0x47   :  { %1183 = vmatpush3.bf16.msra.mxu0 %v1283_v13 }
  0x48   :  { %1184 = vmatprep.subr.bf16.mxu0 %v1287_v16 }
  0x4a   :  { %849 = vmatmul.mubr.bf16.gmra.mrb[12].mxu0 %v1286_v15 }
  0x4b   :  { %1185 = vmatpush3.bf16.msra.mxu0 %v1287_v16  ;;  %1196 = vmatprep.mubr.bf16.mxu0 %v1296_v21 }
  0x4c   :  { %898 = vmatmul.mubr.bf16.gmra.mrb[12].mxu1 %v1290_v18  ;;  %1186 = vmatprep.subr.bf16.mxu0 %v1291_v19 }
  0x4f   :  { %1187 = vmatpush3.bf16.msra.mxu0 %v1291_v19 }
  0x50   :  { %1188 = vmatprep.subr.bf16.mxu0 %v1292_v20 }
  0x53   :  { %1189 = vmatpush3.bf16.msra.mxu0 %v1292_v20 }
  0x54   :  { %1190 = vmatprep.subr.bf16.mxu0 %v1293_v22 }
  0x57   :  { %1191 = vmatpush3.bf16.msra.mxu0 %v1293_v22 }
  0x58   :  { %1192 = vmatprep.subr.bf16.mxu0 %v1294_v23 }
  0x5b   :  { %1193 = vmatpush3.bf16.msra.mxu0 %v1294_v23 }
  0x5c   :  { %1194 = vmatprep.subr.bf16.mxu0 %v1295_v24 }
  0x5f   :  { %1195 = vmatpush3.bf16.msra.mxu0 %v1295_v24 }
  0x62   :  { %1197 = vmatmul.mubr.bf16.vlgmr.msra.gmra.mrb[16].mxu0 %v1297_v25 }
  0xf5   :  { %v1074_v26 = vpop.f32.mrb[0].mxu0 }
  0xf6   :  { %v1075_v28 = vpop.f32.mrb[1].mxu0 }
  0xf7   :  { %v1076_v29 = vadd.f32 %v1075_v28, %v1074_v26  ;;  %v1077_v30 = vpop.f32.mrb[2].mxu0  ;;  %v1102_v31 = vpop.f32.mrb[0].mxu1 }
  0xf8   :  { %v1078_v32 = vpop.f32.mrb[3].mxu0  ;;  %v1103_v35 = vpop.f32.mrb[1].mxu1 }
  0xf9   :  { %v745_v33 = vadd.f32 %v1076_v29, %v967_v27  ;;  %v1079_v34 = vadd.f32 %v1078_v32, %v1077_v30  ;;  %v1104_v36 = vadd.f32 %v1103_v35, %v1102_v31  ;;  %v1105_v37 = vpop.f32.mrb[2].mxu1 }
  0xfa   :  { %v1106_v39 = vpop.f32.mrb[3].mxu1 }
  0xfb   :  { %v748_v38 = vadd.f32 %v1079_v34, %v967_v27  ;;  %v794_v40 = vadd.f32 %v1104_v36, %v745_v33  ;;  %v1107_v41 = vadd.f32 %v1106_v39, %v1105_v37 }
  0xfd   :  { %v797_v42 = vadd.f32 %v1107_v41, %v748_v38  ;;  %v1080_v43 = vpop.f32.mrb[4].mxu0 }
  0xfe   :  { %v1081_v44 = vpop.f32.mrb[5].mxu0 }
  0xff   :  { %v1082_v45 = vadd.f32 %v1081_v44, %v1080_v43  ;;  %v1083_v46 = vpop.f32.mrb[6].mxu0  ;;  %v1108_v47 = vpop.f32.mrb[4].mxu1 }
 0x100   :  { %v1084_v48 = vpop.f32.mrb[7].mxu0  ;;  %v1109_v51 = vpop.f32.mrb[5].mxu1 }
 0x101   :  { %v753_v49 = vadd.f32 %v1082_v45, %v967_v27  ;;  %v1085_v50 = vadd.f32 %v1084_v48, %v1083_v46  ;;  %v1110_v52 = vadd.f32 %v1109_v51, %v1108_v47  ;;  %v1111_v53 = vpop.f32.mrb[6].mxu1 }
 0x102   :  { %v1112_v55 = vpop.f32.mrb[7].mxu1 }
 0x103   :  { %v756_v54 = vadd.f32 %v1085_v50, %v967_v27  ;;  %v802_v56 = vadd.f32 %v1110_v52, %v753_v49  ;;  %v1113_v57 = vadd.f32 %v1112_v55, %v1111_v53 }
 0x105   :  { %v805_v58 = vadd.f32 %v1113_v57, %v756_v54 }
 0x115   :  { %v1130_v59 = vpop.f32.mrb[8].mxu0 }
 0x116   :  { %v1131_v60 = vpop.f32.mrb[9].mxu0 }
 0x117   :  { %v1132_v61 = vadd.f32 %v1131_v60, %v1130_v59  ;;  %v1133_v62 = vpop.f32.mrb[10].mxu0  ;;  %v1158_v63 = vpop.f32.mrb[8].mxu1 }
 0x118   :  { %v1134_v0 = vpop.f32.mrb[11].mxu0  ;;  %v1159_v3 = vpop.f32.mrb[9].mxu1 }
 0x119   :  { %v843_v1 = vadd.f32 %v1132_v61, %v794_v40  ;;  %v1135_v2 = vadd.f32 %v1134_v0, %v1133_v62  ;;  %v1160_v4 = vadd.f32 %v1159_v3, %v1158_v63  ;;  %v1161_v5 = vpop.f32.mrb[10].mxu1 }
 0x11a   :  { %v1162_v7 = vpop.f32.mrb[11].mxu1 }
 0x11b   :  { %v846_v6 = vadd.f32 %v1135_v2, %v797_v42  ;;  %v1163_v8 = vadd.f32 %v1162_v7, %v1161_v5  ;;  %v892_v9 = vadd.f32 %v1160_v4, %v843_v1 }
 0x11d   :  { %v1136_v10 = vpop.f32.mrb[12].mxu0  ;;  %v895_v12 = vadd.f32 %v1163_v8, %v846_v6 }
 0x11e   :  { %v1137_v11 = vpop.f32.mrb[13].mxu0 }
 0x11f   :  { %v1138_v13 = vadd.f32 %v1137_v11, %v1136_v10  ;;  %v1139_v14 = vpop.f32.mrb[14].mxu0  ;;  %v1164_v15 = vpop.f32.mrb[12].mxu1 }
 0x120   :  { %v1140_v16 = vpop.f32.mrb[15].mxu0  ;;  %v1165_v19 = vpop.f32.mrb[13].mxu1 }
 0x121   :  { %v851_v17 = vadd.f32 %v1138_v13, %v802_v56  ;;  %v1141_v18 = vadd.f32 %v1140_v16, %v1139_v14  ;;  %v1166_v20 = vadd.f32 %v1165_v19, %v1164_v15  ;;  %v1167_v21 = vpop.f32.mrb[14].mxu1 }
 0x122   :  { %v1168_v23 = vpop.f32.mrb[15].mxu1 }
 0x123   :  { %v854_v22 = vadd.f32 %v1141_v18, %v805_v58  ;;  %v1169_v24 = vadd.f32 %v1168_v23, %v1167_v21  ;;  %v900_v25 = vadd.f32 %v1166_v20, %v851_v17 }
 0x125   :  { %v903_v26 = vadd.f32 %v1169_v24, %v854_v22 }
 0x135   :  { %v1198_v27 = vpop.f32.mrb[16].mxu0 }
 0x136   :  { %v949_v28 = vadd.f32 %v1198_v27, %v900_v25  ;;  %v940_v29 = vpop.f32.mrb[17].mxu0 }
 0x137   :  { %v941_v30 = vadd.f32 %v940_v29, %v892_v9  ;;  %v1199_v31 = vpop.f32.mrb[18].mxu0 }
 0x138   :  { %v957_v32 = vmax.f32 %v949_v28, 0.0  ;;  %v952_v33 = vadd.f32 %v1199_v31, %v903_v26  ;;  %v943_v34 = vpop.f32.mrb[19].mxu0 }
 0x139   :  { %v955_v35 = vmax.f32 %v941_v30, 0.0  ;;  %v944_v36 = vadd.f32 %v943_v34, %v895_v12 }
 0x13a   :  { %961 = vst [vmem:[%s1606_s3 + $0x10] sm:$0xff] %v957_v32  ;;  %v958_v37 = vmax.f32 %v952_v33, 0.0 }
 0x13b   :  { %959 = vst [vmem:[%s1606_s3] sm:$0xff] %v955_v35  ;;  %v956_v38 = vmax.f32 %v944_v36, 0.0 }
 0x13c   :  { %962 = vst [vmem:[%s1606_s3 + $0x18] sm:$0xff] %v958_v37 }
 0x13d   :  { %960 = vst [vmem:[%s1606_s3 + $0x8] sm:$0xff] %v956_v38 }

// kernel: mnist_encoder_forward.7
= control target key start
LH: loop header
LB: loop body
LE: loop exit
PB: predicated region body
PF: predicated region fallthrough
CT: control target
= control target key end

     0   :  { %v287_v28 = vlaneseq  ;;  %v1961_v36 = vmov 1966171168   ;;  %s2412_s0 = inlined_call_operand.vmem [shape: bf16[2,2048], index: 0, kind: input, shape index: {}]   ;;  %s2413_s1 = inlined_call_operand.vmem [shape: bf16[2048,128], index: 1, kind: input, shape index: {}]   ;;  %s2414_s2 = inlined_call_operand.vmem [shape: f32[1,128], index: 2, kind: input, shape index: {}]   ;;  %s2415_s3 = inlined_call_operand.hbm [shape: f32[2,128], index: 3, kind: output, shape index: {}]  }
   0x1   :  { %v1807_v0 = vld [vmem:[%s2413_s1 + $0x40] sm:$0xff]   ;;  %v1811_v4 = vld [vmem:[%s2413_s1 + $0x48] sm:$0xff]   ;;  %v1815_v8 = vld [vmem:[%s2413_s1 + $0x50] sm:$0xff]   ;;  %v285_v37 = vunpack.c.l.s4 %v1961_v36 }
   0x2   :  { %v1808_v1 = vld [vmem:[%s2413_s1 + $0xc0] sm:$0xff]   ;;  %1629 = vmatprep.subr.bf16.mxu0 %v1807_v0  ;;  %v1812_v5 = vld [vmem:[%s2413_s1 + $0xc8] sm:$0xff]   ;;  %v1816_v9 = vld [vmem:[%s2413_s1 + $0xd0] sm:$0xff]   ;;  %v288_v33 = vshrl.u32 %v287_v28, 7 }
   0x3   :  { %v1809_v2 = vld [vmem:[%s2413_s1] sm:$0xff]   ;;  %1651 = vmatprep.subr.bf16.mxu1 %v1808_v1  ;;  %v1813_v6 = vld [vmem:[%s2413_s1 + $0x8] sm:$0xff]   ;;  %v1817_v10 = vld [vmem:[%s2413_s1 + $0x10] sm:$0xff]   ;;  %v286_v40 = vunpack.c.0.s8 %v285_v37 }
   0x4   :  { %v1810_v3 = vld [vmem:[%s2413_s1 + $0x80] sm:$0xff]   ;;  %1630 = vmatpush3.bf16.msra.mxu0 %v1809_v2  ;;  %v1814_v7 = vld [vmem:[%s2413_s1 + $0x88] sm:$0xff]   ;;  %v1818_v11 = vld [vmem:[%s2413_s1 + $0x90] sm:$0xff]  }
   0x5   :  { %1652 = vmatpush3.bf16.msra.mxu1 %v1810_v3  ;;  %1631 = vmatprep.subr.bf16.mxu0 %v1811_v4  ;;  %v1819_v12 = vld [vmem:[%s2413_s1 + $0x58] sm:$0xff]   ;;  %v1823_v16 = vld [vmem:[%s2413_s1 + $0x60] sm:$0xff]   ;;  %v1827_v20 = vld [vmem:[%s2413_s1 + $0x68] sm:$0xff]   ;;  %v2088_v41 = vsub.s32 %v286_v40, %v288_v33 }
   0x6   :  { %1653 = vmatprep.subr.bf16.mxu1 %v1812_v5  ;;  %v1820_v13 = vld [vmem:[%s2413_s1 + $0xd8] sm:$0xff]   ;;  %v1824_v17 = vld [vmem:[%s2413_s1 + $0xe0] sm:$0xff]   ;;  %v1828_v21 = vld [vmem:[%s2413_s1 + $0xe8] sm:$0xff]  }
   0x7   :  { %v1821_v14 = vld [vmem:[%s2413_s1 + $0x18] sm:$0xff]   ;;  %v1825_v18 = vld [vmem:[%s2413_s1 + $0x20] sm:$0xff]   ;;  %v1829_v22 = vld [vmem:[%s2413_s1 + $0x28] sm:$0xff]  }
   0x8   :  { %1632 = vmatpush3.bf16.msra.mxu0 %v1813_v6  ;;  %v1822_v15 = vld [vmem:[%s2413_s1 + $0x98] sm:$0xff]   ;;  %v1826_v19 = vld [vmem:[%s2413_s1 + $0xa0] sm:$0xff]   ;;  %v1830_v23 = vld [vmem:[%s2413_s1 + $0xa8] sm:$0xff]  }
   0x9   :  { %1654 = vmatpush3.bf16.msra.mxu1 %v1814_v7  ;;  %1633 = vmatprep.subr.bf16.mxu0 %v1815_v8  ;;  %v1831_v24 = vld [vmem:[%s2413_s1 + $0x70] sm:$0xff]   ;;  %v1835_v29 = vld [vmem:[%s2413_s1 + $0x78] sm:$0xff]   ;;  %v16_v34 = vld [vmem:[%s2412_s0] sm:$0xff] }
   0xa   :  { %1655 = vmatprep.subr.bf16.mxu1 %v1816_v9  ;;  %v1832_v25 = vld [vmem:[%s2413_s1 + $0xf0] sm:$0xff]   ;;  %v1836_v30 = vld [vmem:[%s2413_s1 + $0xf8] sm:$0xff]   ;;  %v1840_v35 = vld [vmem:[%s2413_s1 + $0x140] sm:$0xff]   ;;  %v283_v39 = vcombine.high %v16_v34, %v16_v34  ;;  %v290_v42 = vrot.slane %v16_v34, %v2088_v41 }
   0xb   :  { %v1833_v26 = vld [vmem:[%s2413_s1 + $0x30] sm:$0xff]   ;;  %v1837_v31 = vld [vmem:[%s2413_s1 + $0x38] sm:$0xff]   ;;  %v1841_v38 = vld [vmem:[%s2413_s1 + $0x1c0] sm:$0xff]  }
   0xc   :  { %1634 = vmatpush3.bf16.msra.mxu0 %v1817_v10  ;;  %v1834_v27 = vld [vmem:[%s2413_s1 + $0xb0] sm:$0xff]   ;;  %v1838_v32 = vld [vmem:[%s2413_s1 + $0xb8] sm:$0xff]   ;;  %v2092_v43 = vrot.slane %v283_v39, %v2088_v41  ;;  %v298_v44 = vcombine.high %v290_v42, %v290_v42  ;;  %v306_v45 = vrot.slane %v290_v42, %v2088_v41  ;;  %v1842_v48 = vld [vmem:[%s2413_s1 + $0x100] sm:$0xff]  }
   0xd   :  { %1656 = vmatpush3.bf16.msra.mxu1 %v1818_v11  ;;  %1635 = vmatprep.subr.bf16.mxu0 %v1819_v12  ;;  %v1844_v51 = vld [vmem:[%s2413_s1 + $0x148] sm:$0xff]   ;;  %v1843_v53 = vld [vmem:[%s2413_s1 + $0x180] sm:$0xff]   ;;  %v1848_v57 = vld [vmem:[%s2413_s1 + $0x150] sm:$0xff]  }
   0xe   :  { %1657 = vmatprep.subr.bf16.mxu1 %v1820_v13  ;;  %v299_v46 = vcombine.high %v2092_v43, %v2092_v43  ;;  %v320_v47 = vrot.slane %v298_v44, %v2088_v41  ;;  %v328_v50 = vcombine.high %v306_v45, %v306_v45  ;;  %v1845_v54 = vld [vmem:[%s2413_s1 + $0x1c8] sm:$0xff]   ;;  %v1849_v59 = vld [vmem:[%s2413_s1 + $0x1d0] sm:$0xff]   ;;  %v1852_v61 = vld [vmem:[%s2413_s1 + $0x158] sm:$0xff]  }
   0xf   :  { %v1846_v56 = vld [vmem:[%s2413_s1 + $0x108] sm:$0xff]   ;;  %v1850_v60 = vld [vmem:[%s2413_s1 + $0x110] sm:$0xff]   ;;  %v1853_v63 = vld [vmem:[%s2413_s1 + $0x1d8] sm:$0xff]  }
  0x10   :  { %1636 = vmatpush3.bf16.msra.mxu0 %v1821_v14  ;;  %v327_v49 = vrot.slane %v299_v46, %v2088_v41  ;;  %1197 = vmatprep.mubr.bf16.mxu0 %v320_v47  ;;  %v330_v52 = vcombine.high %v320_v47, %v320_v47  ;;  %v1847_v58 = vld [vmem:[%s2413_s1 + $0x188] sm:$0xff]   ;;  %v1851_v62 = vld [vmem:[%s2413_s1 + $0x190] sm:$0xff]   ;;  %v1854_v0 = vld [vmem:[%s2413_s1 + $0x118] sm:$0xff]  }
  0x11   :  { %1658 = vmatpush3.bf16.msra.mxu1 %v1822_v15  ;;  %1637 = vmatprep.subr.bf16.mxu0 %v1823_v16  ;;  %v1856_v1 = vld [vmem:[%s2413_s1 + $0x160] sm:$0xff]   ;;  %v1855_v2 = vld [vmem:[%s2413_s1 + $0x198] sm:$0xff]   ;;  %v1860_v5 = vld [vmem:[%s2413_s1 + $0x168] sm:$0xff]  }
  0x12   :  { %1659 = vmatprep.subr.bf16.mxu1 %v1824_v17  ;;  %v331_v55 = vcombine.high %v327_v49, %v327_v49  ;;  %1237 = vmatprep.mubr.bf16.mxu1 %v330_v52  ;;  %v1857_v3 = vld [vmem:[%s2413_s1 + $0x1e0] sm:$0xff]   ;;  %v1861_v7 = vld [vmem:[%s2413_s1 + $0x1e8] sm:$0xff]   ;;  %v1864_v9 = vld [vmem:[%s2413_s1 + $0x170] sm:$0xff]   ;;  %v313_v17 = vrot.slane %v2092_v43, %v2088_v41 }
  0x13   :  { %v1858_v4 = vld [vmem:[%s2413_s1 + $0x120] sm:$0xff]   ;;  %v1862_v8 = vld [vmem:[%s2413_s1 + $0x128] sm:$0xff]   ;;  %v1865_v11 = vld [vmem:[%s2413_s1 + $0x1f0] sm:$0xff]  }
  0x14   :  { %1638 = vmatpush3.bf16.msra.mxu0 %v1825_v18  ;;  %v1859_v6 = vld [vmem:[%s2413_s1 + $0x1a0] sm:$0xff]   ;;  %v1863_v10 = vld [vmem:[%s2413_s1 + $0x1a8] sm:$0xff]   ;;  %v1866_v12 = vld [vmem:[%s2413_s1 + $0x130] sm:$0xff]  }
  0x15   :  { %1660 = vmatpush3.bf16.msra.mxu1 %v1826_v19  ;;  %1639 = vmatprep.subr.bf16.mxu0 %v1827_v20  ;;  %v1868_v13 = vld [vmem:[%s2413_s1 + $0x178] sm:$0xff]   ;;  %v1867_v14 = vld [vmem:[%s2413_s1 + $0x1b0] sm:$0xff]   ;;  %v1872_v18 = vld [vmem:[%s2413_s1 + $0x240] sm:$0xff]  }
  0x16   :  { %1661 = vmatprep.subr.bf16.mxu1 %v1828_v21  ;;  %v1869_v15 = vld [vmem:[%s2413_s1 + $0x1f8] sm:$0xff]   ;;  %v1873_v20 = vld [vmem:[%s2413_s1 + $0x2c0] sm:$0xff]   ;;  %v1879_v28 = vld [vmem:[%s2413_s1 + $0x288] sm:$0xff]  }
  0x17   :  { %v1870_v16 = vld [vmem:[%s2413_s1 + $0x138] sm:$0xff]   ;;  %v1874_v21 = vld [vmem:[%s2413_s1 + $0x200] sm:$0xff]   ;;  %v1892_v39 = vld [vmem:[%s2413_s1 + $0x268] sm:$0xff]  }
  0x18   :  { %1640 = vmatpush3.bf16.msra.mxu0 %v1829_v22  ;;  %v1871_v19 = vld [vmem:[%s2413_s1 + $0x1b8] sm:$0xff]   ;;  %v329_v22 = vcombine.high %v313_v17, %v313_v17  ;;  %v1889_v37 = vld [vmem:[%s2413_s1 + $0x2e0] sm:$0xff]   ;;  %v1893_v42 = vld [vmem:[%s2413_s1 + $0x2e8] sm:$0xff]  }
  0x19   :  { %1662 = vmatpush3.bf16.msra.mxu1 %v1830_v23  ;;  %1641 = vmatprep.subr.bf16.mxu0 %v1831_v24  ;;  %v1876_v23 = vld [vmem:[%s2413_s1 + $0x248] sm:$0xff]   ;;  %v1875_v24 = vld [vmem:[%s2413_s1 + $0x280] sm:$0xff]   ;;  %v1885_v33 = vld [vmem:[%s2413_s1 + $0x2d8] sm:$0xff]  }
  0x1a   :  { %1663 = vmatprep.subr.bf16.mxu1 %v1832_v25  ;;  %v1877_v25 = vld [vmem:[%s2413_s1 + $0x2c8] sm:$0xff]   ;;  %v1886_v34 = vld [vmem:[%s2413_s1 + $0x218] sm:$0xff]   ;;  %v1891_v40 = vld [vmem:[%s2413_s1 + $0x2a0] sm:$0xff]  }
  0x1b   :  { %v1887_v36 = vld [vmem:[%s2413_s1 + $0x298] sm:$0xff]   ;;  %v1894_v43 = vld [vmem:[%s2413_s1 + $0x228] sm:$0xff]   ;;  %v1896_v44 = vld [vmem:[%s2413_s1 + $0x270] sm:$0xff]  }
  0x1c   :  { %1642 = vmatpush3.bf16.msra.mxu0 %v1833_v26  ;;  %v1878_v26 = vld [vmem:[%s2413_s1 + $0x208] sm:$0xff]  }
  0x1d   :  { %1664 = vmatpush3.bf16.msra.mxu1 %v1834_v27  ;;  %1643 = vmatprep.subr.bf16.mxu0 %v1835_v29  ;;  %v1880_v27 = vld [vmem:[%s2413_s1 + $0x250] sm:$0xff]   ;;  %v1895_v46 = vld [vmem:[%s2413_s1 + $0x2a8] sm:$0xff]  }
  0x1e   :  { %1665 = vmatprep.subr.bf16.mxu1 %v1836_v30  ;;  %v1881_v29 = vld [vmem:[%s2413_s1 + $0x2d0] sm:$0xff]  }
  0x1f   :  { %v1882_v30 = vld [vmem:[%s2413_s1 + $0x210] sm:$0xff]  }
  0x20   :  { %1644 = vmatpush3.bf16.msra.mxu0 %v1837_v31  ;;  %v1884_v31 = vld [vmem:[%s2413_s1 + $0x258] sm:$0xff]  }
  0x21   :  { %1666 = vmatpush3.bf16.msra.mxu1 %v1838_v32  ;;  %1673 = vmatprep.subr.bf16.mxu0 %v1840_v35  ;;  %v1883_v32 = vld [vmem:[%s2413_s1 + $0x290] sm:$0xff]   ;;  %v1888_v35 = vld [vmem:[%s2413_s1 + $0x260] sm:$0xff]  }
  0x22   :  { %1695 = vmatprep.subr.bf16.mxu1 %v1841_v38  ;;  %v1890_v38 = vld [vmem:[%s2413_s1 + $0x220] sm:$0xff]  }
  0x23   :  { %1198 = vmatmul.mubr.bf16.vlgmr.msra.gmra.mrb[0].mxu0 %v306_v45  ;;  %v17_v45 = vld [vmem:[%s2412_s0 + $0x8] sm:$0xff] }
  0x24   :  { %1674 = vmatpush3.bf16.msra.mxu0 %v1842_v48  ;;  %1238 = vmatmul.mubr.bf16.vlgmr.msra.gmra.mrb[0].mxu1 %v328_v50  ;;  %v339_v47 = vrot.slane %v17_v45, %v2088_v41  ;;  %v332_v48 = vcombine.high %v17_v45, %v17_v45  ;;  %v1898_v50 = vld [vmem:[%s2413_s1 + $0x230] sm:$0xff]  }
  0x25   :  { %1675 = vmatprep.subr.bf16.mxu0 %v1844_v51  ;;  %1696 = vmatpush3.bf16.msra.mxu1 %v1843_v53  ;;  %v1900_v53 = vld [vmem:[%s2413_s1 + $0x278] sm:$0xff]  }
  0x26   :  { %1277 = vmatprep.mubr.bf16.mxu0 %v327_v49  ;;  %1697 = vmatprep.subr.bf16.mxu1 %v1845_v54  ;;  %v1897_v49 = vld [vmem:[%s2413_s1 + $0x2f0] sm:$0xff]   ;;  %v347_v51 = vcombine.high %v339_v47, %v339_v47  ;;  %v2277_v52 = vrot.slane %v332_v48, %v2088_v41 }
  0x27   :  { %1317 = vmatprep.mubr.bf16.mxu1 %v331_v55  ;;  %v1899_v54 = vld [vmem:[%s2413_s1 + $0x2b0] sm:$0xff]  }
  0x28   :  { %1676 = vmatpush3.bf16.msra.mxu0 %v1846_v56  ;;  %v369_v55 = vrot.slane %v347_v51, %v2088_v41  ;;  %v348_v56 = vcombine.high %v2277_v52, %v2277_v52 }
  0x29   :  { %1677 = vmatprep.subr.bf16.mxu0 %v1848_v57  ;;  %1698 = vmatpush3.bf16.msra.mxu1 %v1847_v58  ;;  %v1901_v57 = vld [vmem:[%s2413_s1 + $0x2f8] sm:$0xff]  }
  0x2a   :  { %1699 = vmatprep.subr.bf16.mxu1 %v1849_v59  ;;  %v1902_v58 = vld [vmem:[%s2413_s1 + $0x238] sm:$0xff]   ;;  %v379_v59 = vcombine.high %v369_v55, %v369_v55 }
  0x2c   :  { %1678 = vmatpush3.bf16.msra.mxu0 %v1850_v60  ;;  %v355_v60 = vrot.slane %v339_v47, %v2088_v41 }
  0x2d   :  { %1679 = vmatprep.subr.bf16.mxu0 %v1852_v61  ;;  %1700 = vmatpush3.bf16.msra.mxu1 %v1851_v62  ;;  %v1904_v61 = vld [vmem:[%s2413_s1 + $0x340] sm:$0xff]   ;;  %v1903_v62 = vld [vmem:[%s2413_s1 + $0x2b8] sm:$0xff]  }
  0x2e   :  { %1701 = vmatprep.subr.bf16.mxu1 %v1853_v63  ;;  %v376_v63 = vrot.slane %v348_v56, %v2088_v41 }
  0x30   :  { %1680 = vmatpush3.bf16.msra.mxu0 %v1854_v0  ;;  %v1905_v0 = vld [vmem:[%s2413_s1 + $0x3c0] sm:$0xff]  }
  0x31   :  { %1681 = vmatprep.subr.bf16.mxu0 %v1856_v1  ;;  %1702 = vmatpush3.bf16.msra.mxu1 %v1855_v2  ;;  %v1906_v1 = vld [vmem:[%s2413_s1 + $0x300] sm:$0xff]   ;;  %v377_v2 = vcombine.high %v355_v60, %v355_v60 }
  0x32   :  { %1703 = vmatprep.subr.bf16.mxu1 %v1857_v3  ;;  %v1908_v3 = vld [vmem:[%s2413_s1 + $0x348] sm:$0xff]  }
  0x34   :  { %1682 = vmatpush3.bf16.msra.mxu0 %v1858_v4  ;;  %v1907_v4 = vld [vmem:[%s2413_s1 + $0x380] sm:$0xff]  }
  0x35   :  { %1683 = vmatprep.subr.bf16.mxu0 %v1860_v5  ;;  %1704 = vmatpush3.bf16.msra.mxu1 %v1859_v6  ;;  %v380_v5 = vcombine.high %v376_v63, %v376_v63  ;;  %v1909_v6 = vld [vmem:[%s2413_s1 + $0x3c8] sm:$0xff]  }
  0x36   :  { %1705 = vmatprep.subr.bf16.mxu1 %v1861_v7  ;;  %v1910_v7 = vld [vmem:[%s2413_s1 + $0x308] sm:$0xff]  }
  0x38   :  { %1684 = vmatpush3.bf16.msra.mxu0 %v1862_v8  ;;  %v1912_v8 = vld [vmem:[%s2413_s1 + $0x350] sm:$0xff]  }
  0x39   :  { %1685 = vmatprep.subr.bf16.mxu0 %v1864_v9  ;;  %1706 = vmatpush3.bf16.msra.mxu1 %v1863_v10  ;;  %v1911_v9 = vld [vmem:[%s2413_s1 + $0x388] sm:$0xff]   ;;  %v1913_v10 = vld [vmem:[%s2413_s1 + $0x3d0] sm:$0xff]  }
  0x3a   :  { %1707 = vmatprep.subr.bf16.mxu1 %v1865_v11  ;;  %v1914_v11 = vld [vmem:[%s2413_s1 + $0x310] sm:$0xff]  }
  0x3c   :  { %1686 = vmatpush3.bf16.msra.mxu0 %v1866_v12  ;;  %v1916_v12 = vld [vmem:[%s2413_s1 + $0x358] sm:$0xff]  }
  0x3d   :  { %1687 = vmatprep.subr.bf16.mxu0 %v1868_v13  ;;  %1708 = vmatpush3.bf16.msra.mxu1 %v1867_v14  ;;  %v1915_v13 = vld [vmem:[%s2413_s1 + $0x390] sm:$0xff]   ;;  %v1917_v14 = vld [vmem:[%s2413_s1 + $0x3d8] sm:$0xff]  }
  0x3e   :  { %1709 = vmatprep.subr.bf16.mxu1 %v1869_v15  ;;  %v1918_v15 = vld [vmem:[%s2413_s1 + $0x318] sm:$0xff]  }
  0x40   :  { %1688 = vmatpush3.bf16.msra.mxu0 %v1870_v16  ;;  %v1920_v16 = vld [vmem:[%s2413_s1 + $0x360] sm:$0xff]  }
  0x41   :  { %1717 = vmatprep.subr.bf16.mxu0 %v1872_v18  ;;  %1710 = vmatpush3.bf16.msra.mxu1 %v1871_v19  ;;  %v1921_v18 = vld [vmem:[%s2413_s1 + $0x3e0] sm:$0xff]  }
  0x42   :  { %1739 = vmatprep.subr.bf16.mxu1 %v1873_v20  ;;  %v1922_v19 = vld [vmem:[%s2413_s1 + $0x320] sm:$0xff]   ;;  %v1924_v20 = vld [vmem:[%s2413_s1 + $0x368] sm:$0xff]  }
  0x43   :  { %1278 = vmatmul.mubr.bf16.vlgmr.msra.gmra.mrb[4].mxu0 %v313_v17  ;;  %v1919_v17 = vld [vmem:[%s2413_s1 + $0x398] sm:$0xff]  }
  0x44   :  { %1718 = vmatpush3.bf16.msra.mxu0 %v1874_v21  ;;  %1318 = vmatmul.mubr.bf16.vlgmr.msra.gmra.mrb[4].mxu1 %v329_v22  ;;  %v1923_v21 = vld [vmem:[%s2413_s1 + $0x3a0] sm:$0xff]   ;;  %v1925_v22 = vld [vmem:[%s2413_s1 + $0x3e8] sm:$0xff]  }
  0x45   :  { %1719 = vmatprep.subr.bf16.mxu0 %v1876_v23  ;;  %1740 = vmatpush3.bf16.msra.mxu1 %v1875_v24  ;;  %v1926_v23 = vld [vmem:[%s2413_s1 + $0x328] sm:$0xff]   ;;  %v1928_v24 = vld [vmem:[%s2413_s1 + $0x370] sm:$0xff]  }
  0x46   :  { %1741 = vmatprep.subr.bf16.mxu1 %v1877_v25  ;;  %1357 = vmatprep.mubr.bf16.mxu0 %v369_v55 }
  0x47   :  { %1397 = vmatprep.mubr.bf16.mxu1 %v379_v59 }
  0x48   :  { %1720 = vmatpush3.bf16.msra.mxu0 %v1878_v26 }
  0x49   :  { %1721 = vmatprep.subr.bf16.mxu0 %v1880_v27  ;;  %1742 = vmatpush3.bf16.msra.mxu1 %v1879_v28 }
  0x4a   :  { %1743 = vmatprep.subr.bf16.mxu1 %v1881_v29 }
  0x4c   :  { %1722 = vmatpush3.bf16.msra.mxu0 %v1882_v30 }
  0x4d   :  { %1723 = vmatprep.subr.bf16.mxu0 %v1884_v31  ;;  %1744 = vmatpush3.bf16.msra.mxu1 %v1883_v32 }
  0x4e   :  { %1745 = vmatprep.subr.bf16.mxu1 %v1885_v33 }
  0x50   :  { %1724 = vmatpush3.bf16.msra.mxu0 %v1886_v34 }
  0x51   :  { %1725 = vmatprep.subr.bf16.mxu0 %v1888_v35  ;;  %1746 = vmatpush3.bf16.msra.mxu1 %v1887_v36 }
  0x52   :  { %1747 = vmatprep.subr.bf16.mxu1 %v1889_v37 }
  0x54   :  { %1726 = vmatpush3.bf16.msra.mxu0 %v1890_v38 }
  0x55   :  { %1727 = vmatprep.subr.bf16.mxu0 %v1892_v39  ;;  %1748 = vmatpush3.bf16.msra.mxu1 %v1891_v40 }
  0x56   :  { %1749 = vmatprep.subr.bf16.mxu1 %v1893_v42 }
  0x58   :  { %1728 = vmatpush3.bf16.msra.mxu0 %v1894_v43 }
  0x59   :  { %1729 = vmatprep.subr.bf16.mxu0 %v1896_v44  ;;  %1750 = vmatpush3.bf16.msra.mxu1 %v1895_v46 }
  0x5a   :  { %1751 = vmatprep.subr.bf16.mxu1 %v1897_v49 }
  0x5c   :  { %1730 = vmatpush3.bf16.msra.mxu0 %v1898_v50 }
  0x5d   :  { %1731 = vmatprep.subr.bf16.mxu0 %v1900_v53  ;;  %1752 = vmatpush3.bf16.msra.mxu1 %v1899_v54 }
  0x5e   :  { %1753 = vmatprep.subr.bf16.mxu1 %v1901_v57 }
  0x60   :  { %1732 = vmatpush3.bf16.msra.mxu0 %v1902_v58 }
  0x61   :  { %1761 = vmatprep.subr.bf16.mxu0 %v1904_v61  ;;  %1754 = vmatpush3.bf16.msra.mxu1 %v1903_v62 }
  0x62   :  { %1783 = vmatprep.subr.bf16.mxu1 %v1905_v0 }
  0x63   :  { %1358 = vmatmul.mubr.bf16.vlgmr.msra.gmra.mrb[8].mxu0 %v355_v60 }
  0x64   :  { %1762 = vmatpush3.bf16.msra.mxu0 %v1906_v1  ;;  %1437 = vmatprep.mubr.bf16.mxu0 %v376_v63 }
  0x65   :  { %1398 = vmatmul.mubr.bf16.vlgmr.msra.gmra.mrb[8].mxu1 %v377_v2  ;;  %1763 = vmatprep.subr.bf16.mxu0 %v1908_v3 }
  0x66   :  { %1784 = vmatpush3.bf16.msra.mxu1 %v1907_v4  ;;  %1477 = vmatprep.mubr.bf16.mxu1 %v380_v5 }
  0x67   :  { %1785 = vmatprep.subr.bf16.mxu1 %v1909_v6 }
  0x68   :  { %1764 = vmatpush3.bf16.msra.mxu0 %v1910_v7 }
  0x69   :  { %1765 = vmatprep.subr.bf16.mxu0 %v1912_v8 }
  0x6a   :  { %1786 = vmatpush3.bf16.msra.mxu1 %v1911_v9 }
  0x6b   :  { %1787 = vmatprep.subr.bf16.mxu1 %v1913_v10 }
  0x6c   :  { %1766 = vmatpush3.bf16.msra.mxu0 %v1914_v11 }
  0x6d   :  { %1767 = vmatprep.subr.bf16.mxu0 %v1916_v12 }
  0x6e   :  { %1788 = vmatpush3.bf16.msra.mxu1 %v1915_v13 }
  0x6f   :  { %1789 = vmatprep.subr.bf16.mxu1 %v1917_v14 }
  0x70   :  { %1768 = vmatpush3.bf16.msra.mxu0 %v1918_v15 }
  0x71   :  { %1769 = vmatprep.subr.bf16.mxu0 %v1920_v16 }
  0x72   :  { %1790 = vmatpush3.bf16.msra.mxu1 %v1919_v17 }
  0x73   :  { %1791 = vmatprep.subr.bf16.mxu1 %v1921_v18 }
  0x74   :  { %1770 = vmatpush3.bf16.msra.mxu0 %v1922_v19 }
  0x75   :  { %1771 = vmatprep.subr.bf16.mxu0 %v1924_v20 }
  0x76   :  { %8 = vsyncpa [#allocation3], 0  ;;  %1792 = vmatpush3.bf16.msra.mxu1 %v1923_v21  ;;  %v1927_v25 = vld [vmem:[%s2413_s1 + $0x3a8] sm:$0xff]   ;;  %v1929_v26 = vld [vmem:[%s2413_s1 + $0x3f0] sm:$0xff]   ;;  %v362_v32 = vrot.slane %v2277_v52, %v2088_v41 }
  0x77   :  { %1793 = vmatprep.subr.bf16.mxu1 %v1925_v22  ;;  %v1930_v27 = vld [vmem:[%s2413_s1 + $0x330] sm:$0xff]   ;;  %v1932_v28 = vld [vmem:[%s2413_s1 + $0x378] sm:$0xff]   ;;  %v1500_v36 = vld [vmem:[%s2414_s2] ss:$0 sm:$0xff] }
  0x78   :  { %1772 = vmatpush3.bf16.msra.mxu0 %v1926_v23  ;;  %v1931_v29 = vld [vmem:[%s2413_s1 + $0x3b0] sm:$0xff]   ;;  %v1933_v30 = vld [vmem:[%s2413_s1 + $0x3f8] sm:$0xff]   ;;  %v378_v34 = vcombine.high %v362_v32, %v362_v32 }
  0x79   :  { %1773 = vmatprep.subr.bf16.mxu0 %v1928_v24  ;;  %v1934_v31 = vld [vmem:[%s2413_s1 + $0x338] sm:$0xff]  }
  0x7a   :  { %1794 = vmatpush3.bf16.msra.mxu1 %v1927_v25  ;;  %v1935_v33 = vld [vmem:[%s2413_s1 + $0x3b8] sm:$0xff]   ;;  %s1962_s1 = smov [#allocation2]  }
  0x7b   :  { %1795 = vmatprep.subr.bf16.mxu1 %v1929_v26  ;;  %s1492_s2 = sshll.u32 %s1962_s1, 4  ;;  %s1493_s2 = int_to_ptr.vmem [resolvable:$true] %s1492_s2 }
  0x7c   :  { %1774 = vmatpush3.bf16.msra.mxu0 %v1930_v27  ;;  %s1937_s28 = scalar_lea.vmem %s1493_s2, 32  ;;  %p1942_p1 = scmp.lt.s32.totalorder %s1493_s2, %s1493_s2 }
  0x7d   :  { %1775 = vmatprep.subr.bf16.mxu0 %v1932_v28  ;;  %p1938_p0 = scmp.ne.s32.totalorder %s1493_s2, %s1937_s28  ;;  %p1943_p2 = scmp.lt.s32.totalorder %s1937_s28, %s1937_s28 }
  0x7e   :  { %1796 = vmatpush3.bf16.msra.mxu1 %v1931_v29 }
  0x7f   :  { %1797 = vmatprep.subr.bf16.mxu1 %v1933_v30  ;;  %p1944_p3 = por %p1943_p2, %p1942_p1 }
  0x80   :  { %1776 = vmatpush3.bf16.msra.mxu0 %v1934_v31 }
  0x81   :  { %p1945_p4 = pnand %p1944_p3, %p1938_p0 }
  0x82   :  { %1798 = vmatpush3.bf16.msra.mxu1 %v1935_v33 }
  0x83   :  { %1438 = vmatmul.mubr.bf16.vlgmr.msra.gmra.mrb[12].mxu0 %v362_v32 }
  0x85   :  { %1478 = vmatmul.mubr.bf16.vlgmr.msra.gmra.mrb[12].mxu1 %v378_v34 }
  0xf6   :  { %v1645_v35 = vpop.f32.mrb[0].mxu0 }
  0xf7   :  { %v1646_v37 = vpop.f32.mrb[1].mxu0  ;;  %v1667_v38 = vpop.f32.mrb[0].mxu1 }
  0xf8   :  { %v1647_v39 = vadd.f32 %v1646_v37, %v1645_v35  ;;  %v1648_v41 = vpop.f32.mrb[2].mxu0  ;;  %v1668_v40 = vpop.f32.mrb[1].mxu1 }
  0xf9   :  { %v1649_v42 = vpop.f32.mrb[3].mxu0  ;;  %v1669_v44 = vadd.f32 %v1668_v40, %v1667_v38  ;;  %v1670_v45 = vpop.f32.mrb[2].mxu1 }
  0xfa   :  { %v1200_v43 = vadd.f32 %v1647_v39, %v1500_v36  ;;  %v1671_v46 = vpop.f32.mrb[3].mxu1 }
  0xfc   :  { %v1240_v47 = vadd.f32 %v1669_v44, %v1200_v43 }
 0x116   :  { %v1689_v48 = vpop.f32.mrb[4].mxu0 }
 0x117   :  { %v1690_v49 = vpop.f32.mrb[5].mxu0  ;;  %v1711_v50 = vpop.f32.mrb[4].mxu1 }
 0x118   :  { %v1691_v51 = vadd.f32 %v1690_v49, %v1689_v48  ;;  %v1692_v52 = vpop.f32.mrb[6].mxu0  ;;  %v1712_v53 = vpop.f32.mrb[5].mxu1 }
 0x119   :  { %v1693_v54 = vpop.f32.mrb[7].mxu0  ;;  %v1713_v56 = vadd.f32 %v1712_v53, %v1711_v50  ;;  %v1714_v57 = vpop.f32.mrb[6].mxu1 }
 0x11a   :  { %v1280_v55 = vadd.f32 %v1691_v51, %v1240_v47  ;;  %v1715_v58 = vpop.f32.mrb[7].mxu1 }
 0x11c   :  { %v1320_v59 = vadd.f32 %v1713_v56, %v1280_v55 }
 0x136   :  { %v1733_v60 = vpop.f32.mrb[8].mxu0 }
 0x137   :  { %v1734_v61 = vpop.f32.mrb[9].mxu0 }
 0x138   :  { %v1755_v62 = vpop.f32.mrb[8].mxu1  ;;  %v1735_v63 = vadd.f32 %v1734_v61, %v1733_v60  ;;  %v1736_v0 = vpop.f32.mrb[10].mxu0 }
 0x139   :  { %v1756_v1 = vpop.f32.mrb[9].mxu1  ;;  %v1737_v2 = vpop.f32.mrb[11].mxu0 }
 0x13a   :  { %v1360_v3 = vadd.f32 %v1735_v63, %v1320_v59  ;;  %v1757_v4 = vadd.f32 %v1756_v1, %v1755_v62  ;;  %v1758_v5 = vpop.f32.mrb[10].mxu1 }
 0x13b   :  { %v1759_v6 = vpop.f32.mrb[11].mxu1 }
 0x13c   :  { %v1400_v7 = vadd.f32 %v1757_v4, %v1360_v3 }
 0x156   :  { %v1777_v8 = vpop.f32.mrb[12].mxu0 }
 0x157   :  { %v1778_v9 = vpop.f32.mrb[13].mxu0 }
 0x158   :  { %v1799_v10 = vpop.f32.mrb[12].mxu1  ;;  %v1779_v11 = vadd.f32 %v1778_v9, %v1777_v8  ;;  %v1780_v12 = vpop.f32.mrb[14].mxu0 }
 0x159   :  { %v1800_v13 = vpop.f32.mrb[13].mxu1  ;;  %v1781_v14 = vpop.f32.mrb[15].mxu0 }
 0x15a   :  { %v1440_v15 = vadd.f32 %v1779_v11, %v1400_v7  ;;  %v1801_v16 = vadd.f32 %v1800_v13, %v1799_v10  ;;  %v1802_v17 = vpop.f32.mrb[14].mxu1 }
 0x15b   :  { %v1803_v18 = vpop.f32.mrb[15].mxu1 }
 0x15c   :  { %v1480_v19 = vadd.f32 %v1801_v16, %v1440_v15 }
 0x15e   :  { %1485 = vst [vmem:[#allocation2] sm:$0x3] %v1480_v19 }
 0x15f   :  { %1948 = shalt.err (!%p1945_p4)
}
 0x160   :  { %s1949_s4 = scalar_lea.hbm %s2415_s3, 32 }
 0x161   :  { %p1950_p5 = scmp.ne.s32.totalorder %s2415_s3, %s1949_s4  ;;  %p1953_p6 = scmp.lt.u32.totalorder %s1949_s4, %s2415_s3 }
 0x163   :  { %p1955_p7 = pnand %p1953_p6, %p1950_p5 }
 0x165   :  { %1958 = shalt.err (!%p1955_p7)
}
 0x166   :  { %1495 = dma.vmem_to_hbm [thread:$0]  %s1493_s2, 32, %s2415_s3, [#allocation3]  }
 0x167   :  { %1959 = dma.done.wait [#allocation3], 32  }
 0x168   :  { %1960 = vsyncadd [#allocation3], 4294967264 }
 0x169   :  { %1499 = vsyncpa [#allocation3], 1 }

</bundles_post_ra>
